<compile_context>
chip_gen: v7x
topology: tpu7x:2x2x1
jax: 0.10.0
libtpu: 0.0.40
codegen_flags: <defaults>
</compile_context>

<pallas_src>
import functools

import jax
import jax.numpy as jnp
from jax.experimental import pallas as pl
from jax.experimental.pallas import tpu as pltpu


def _round_up(x, m):
    return -(-x // m) * m


# -----------------------------------------------------------------------------
# Bilinear upsampling matching torch.nn.functional.interpolate(mode='bilinear').
# Host-side gather/lerp glue; all conv compute lives in the Pallas kernel.
# -----------------------------------------------------------------------------
def upsample_bilinear(x, out_h, out_w, align_corners):
    # x: (B, C, h0, w0) -> (B, C, out_h, out_w)
    _, _, h0, w0 = x.shape

    def coords(out_size, in_size):
        i = jnp.arange(out_size, dtype=jnp.float32)
        if align_corners:
            if out_size == 1:
                src = jnp.zeros_like(i)
            else:
                src = i * (in_size - 1) / (out_size - 1)
        else:
            src = (i + 0.5) * in_size / out_size - 0.5
            src = jnp.maximum(src, 0.0)
        i0 = jnp.clip(jnp.floor(src).astype(jnp.int32), 0, in_size - 1)
        i1 = jnp.clip(i0 + 1, 0, in_size - 1)
        frac = src - i0.astype(jnp.float32)
        return i0, i1, frac

    y0, y1, fy = coords(out_h, h0)
    x0, x1, fx = coords(out_w, w0)
    top = x[:, :, y0, :]
    bot = x[:, :, y1, :]
    row = top * (1.0 - fy)[None, None, :, None] + bot * fy[None, None, :, None]
    left = row[:, :, :, x0]
    right = row[:, :, :, x1]
    return left * (1.0 - fx) + right * fx


# -----------------------------------------------------------------------------
# Pallas kernel.  Per (image, row-band) grid step, everything in (C, cols)
# layout with channels on sublanes and flattened spatial columns on lanes:
#   fused (conv_output|conv_input) 3x3 + bias + ReLU   -> one im2col matmul
#   conv_output2 3x3 + bias + ReLU                     -> one im2col matmul
#   1x1 conv (no bias) on concat + residual add        -> one matmul
#
# The band's window (length L + 4P, P >= W+1) of the flat zero-padded image is
# supplied by the BlockSpec, so every tap is a static lane-offset load.
# Vertical "SAME" padding is handled by the flat zero padding; horizontal
# padding by the per-tap mask rows.  conv_input is evaluated over the band plus
# a P-column halo so conv_output2 never needs data from neighbouring bands.
# -----------------------------------------------------------------------------
def refine_kernel(x_ref, masks_ref, w1_ref, b1_ref, w2_ref, b2_ref, wf_ref,
                  out_ref, ci_scr, *, W, mfc, c_mid_p, L, P):
    Lp = L + 2 * P                      # band + halo columns
    cdt = w1_ref.dtype                  # conv matmul operand dtype (f32/bf16)

    # One 3x3 "same" conv as a single im2col matmul with channels on sublanes:
    # cols is (9*Cin_p, n_cols), weights are (Cout_p, 9*Cin_p).
    def conv3x3(src_ref, w_ref, b_ref, n_cols, mask0):
        taps = []
        for di in range(3):
            for dj in range(3):
                off = (di - 1) * W + (dj - 1)
                t = src_ref[:, pl.ds(P + off, n_cols)].astype(cdt)
                if dj != 1:  # horizontal boundary mask (vertical is zero-pad)
                    t = t * masks_ref[pl.ds(dj, 1), pl.ds(mask0, n_cols)]
                taps.append(t)
        cols = jnp.concatenate(taps, axis=0)             # (9*Cin_p, n_cols)
        acc = jnp.dot(w_ref[...], cols, preferred_element_type=jnp.float32)
        return jnp.maximum(acc + b_ref[...], 0.0)        # bias + ReLU

    # Fused conv_output | conv_input over the band + 1-row halo.
    both = conv3x3(x_ref, w1_ref, b1_ref, Lp, P)         # (2*c_mid_p, Lp)

    # Zero conv_input at out-of-image halo positions and stage it for conv2.
    vvalid = masks_ref[pl.ds(1, 1), pl.ds(P, Lp)]
    ci_scr[...] = (both[c_mid_p:, :] * vvalid).astype(cdt)

    # conv_output2 over the band centre only.
    co2 = conv3x3(ci_scr, w2_ref, b2_ref, L, 2 * P)      # (c_mid_p, L)

    # 1x1 conv (no bias) on concat([conv_output, conv_output2]) + residual.
    cat = jnp.concatenate([both[:c_mid_p, P:P + L], co2], axis=0)
    res = jnp.dot(wf_ref[...], cat, preferred_element_type=jnp.float32)
    up_band = x_ref[pl.ds(0, mfc), pl.ds(2 * P, L)]      # upsampled field
    out_ref[...] = (res + up_band).astype(out_ref.dtype)


def _pick_band(HW, c_in_p, c_mid_p):
    """Band length L (multiple of 128 dividing HW) bounding the im2col size."""
    rows = 9 * max(c_in_p, c_mid_p)
    target = max(512, min(32768, (6 << 20) // (rows * 4)))
    if HW <= target:
        return HW, 1
    d = (min(target, HW) // 128) * 128
    while d >= 128:
        if HW % d == 0:
            return d, HW // d
        d -= 128
    # TODO(synk): ragged last band (pl.BoundedSlice) when HW has no
    # 128-multiple divisor; falls back to a single band per image.
    return HW, 1


def refine_motion_field(motion_field, layer, params, align_corners):
    """motion_field: (B, mfc, h0, w0), layer: (B, lc, H, W)  (NCHW, as in PyTorch)."""
    w_o, b_o, w_i, b_i, w_o2, b_o2, w_f = params
    B, lc, H, W = layer.shape
    mfc = motion_field.shape[1]
    c_in = mfc + lc
    c_mid = max(4, lc)
    HW = H * W
    c_in_p = _round_up(c_in, 8)           # pad channels so sublane concat is free
    c_mid_p = _round_up(c_mid, 8)
    P = _round_up(W + 1, 128)             # halo (covers one conv row + col)
    HWP = HW + 4 * P                      # flat zero-padded length

    # bf16 matmul operands (f32 accumulation) only when the contraction is MXU
    # sized; shallow pyramid levels stay f32.
    # TODO(synk): validate bf16 tolerance at deep (large-channel) levels.
    conv_dtype = jnp.bfloat16 if 9 * c_in >= 128 else jnp.float32

    # ---- host glue: upsample, concat, channel-pad, flat zero-pad ------------
    up = upsample_bilinear(motion_field.astype(jnp.float32), H, W, align_corners)
    x = jnp.concatenate([up, layer.astype(jnp.float32)], axis=1).reshape(B, c_in, HW)
    xpad = jnp.pad(x, ((0, 0), (0, c_in_p - c_in), (2 * P, 2 * P)))  # (B,c_in_p,HWP)

    # Horizontal-validity masks over the padded flat domain (one row per dj);
    # the dj==1 row doubles as the in-image indicator that zeroes the conv halo.
    w_idx = jnp.arange(HW, dtype=jnp.int32) % W
    masks = jnp.stack([w_idx >= 1,
                       jnp.ones((HW,), jnp.bool_),
                       w_idx <= W - 2]).astype(conv_dtype)
    mpad = jnp.pad(masks, ((0, 0), (2 * P, 2 * P)))                  # (3, HWP)

    # Row-band tiling: overlapping band windows (band + 4P halo columns) are
    # materialized host-side so every in-kernel lane slice is static.  The band
    # axis is a second "parallel" grid axis -> both v7x TensorCores get work
    # even when B == 1.
    L, n_bands = _pick_band(HW, c_in_p, c_mid_p)
    Lw = L + 4 * P
    x_bands = jnp.stack([xpad[:, :, t * L:t * L + Lw] for t in range(n_bands)],
                        axis=1)                                      # (B,nb,c_in_p,Lw)
    m_bands = jnp.stack([mpad[:, t * L:t * L + Lw] for t in range(n_bands)],
                        axis=0)                                      # (nb,3,Lw)

    # ---- weights: channel-pad to 8-sublane multiples, im2col (Cout, 9*Cin) --
    def pad_hwio(w, cin_p, cout_p):
        return jnp.pad(w, ((0, 0), (0, 0),
                           (0, cin_p - w.shape[2]), (0, cout_p - w.shape[3])))

    w1 = jnp.concatenate([pad_hwio(w_o, c_in_p, c_mid_p),
                          pad_hwio(w_i, c_in_p, c_mid_p)], axis=-1)
    w1t = w1.reshape(9 * c_in_p, 2 * c_mid_p).T.astype(conv_dtype)
    b1 = jnp.concatenate([jnp.pad(b_o, (0, c_mid_p - c_mid)),
                          jnp.pad(b_i, (0, c_mid_p - c_mid))]
                         ).reshape(-1, 1).astype(jnp.float32)
    w2t = pad_hwio(w_o2, c_mid_p, c_mid_p).reshape(
        9 * c_mid_p, c_mid_p).T.astype(conv_dtype)
    b2 = jnp.pad(b_o2, (0, c_mid_p - c_mid)).reshape(-1, 1).astype(jnp.float32)
    wf_p = jnp.zeros((2 * c_mid_p, mfc), jnp.float32)
    wf_p = wf_p.at[:c_mid].set(w_f[:c_mid])
    wf_p = wf_p.at[c_mid_p:c_mid_p + c_mid].set(w_f[c_mid:])
    wft = wf_p.T                                                     # (mfc, 2*c_mid_p)

    kern = functools.partial(refine_kernel, W=W, mfc=mfc, c_mid_p=c_mid_p,
                             L=L, P=P)

    cost = pl.CostEstimate(
        flops=2 * B * HW * (9 * c_in_p * 2 * c_mid_p + 9 * c_mid_p * c_mid_p
                            + 2 * c_mid_p * mfc),
        transcendentals=0,
        bytes_accessed=4 * B * (c_in_p * n_bands * Lw + mfc * HW)
        + 4 * 3 * n_bands * Lw
        + 4 * int(w1t.size + b1.size + w2t.size + b2.size + wft.size))

    it = 2 if conv_dtype == jnp.bfloat16 else 4
    Lp = L + 2 * P
    est = (2 * (4 * c_in_p * Lw + it * 8 * Lw)        # x + mask blocks, dbl-buffered
           + 2 * 4 * mfc * L                          # output block, dbl-buffered
           + it * 9 * c_in_p * Lp                     # conv1 im2col
           + 4 * 2 * c_mid_p * Lp                     # fused conv1 output
           + it * c_mid_p * Lp                        # ci staging scratch
           + it * 9 * c_mid_p * L                     # conv2 im2col
           + 4 * (3 * c_mid_p + mfc) * L)             # co2 / cat / result
    vmem_limit = int(min(48 * 2 ** 20, max(32 * 2 ** 20, 2 * est)))

    # TODO(synk): pipeline_mode=pl.Buffered(1) on the grid-invariant weight
    # blocks would drop their (tiny) double buffers.
    out_flat = pl.pallas_call(
        kern,
        out_shape=jax.ShapeDtypeStruct((B, mfc, HW), jnp.float32),
        grid_spec=pltpu.PrefetchScalarGridSpec(
            num_scalar_prefetch=0,
            grid=(B, n_bands),
            in_specs=[
                pl.BlockSpec((None, None, c_in_p, Lw), lambda b, t: (b, t, 0, 0)),
                pl.BlockSpec((None, 3, Lw), lambda b, t: (t, 0, 0)),
                pl.BlockSpec((2 * c_mid_p, 9 * c_in_p), lambda b, t: (0, 0)),
                pl.BlockSpec((2 * c_mid_p, 1), lambda b, t: (0, 0)),
                pl.BlockSpec((c_mid_p, 9 * c_mid_p), lambda b, t: (0, 0)),
                pl.BlockSpec((c_mid_p, 1), lambda b, t: (0, 0)),
                pl.BlockSpec((mfc, 2 * c_mid_p), lambda b, t: (0, 0)),
            ],
            out_specs=pl.BlockSpec((None, mfc, L), lambda b, t: (b, 0, t)),
            scratch_shapes=[pltpu.VMEM((c_mid_p, L + 2 * P), conv_dtype)],
        ),
        compiler_params=pltpu.CompilerParams(
            dimension_semantics=("parallel", "parallel"),
            vmem_limit_bytes=vmem_limit),
        cost_estimate=cost,
    )(x_bands, m_bands, w1t, b1, w2t, b2, wft)

    return out_flat.reshape(B, mfc, H, W)


# -----------------------------------------------------------------------------
# Deterministic parameter init (xavier-uniform weights, HWIO layout).  The
# PyTorch module zero-inits biases; small random biases are used here so the
# bias path is actually exercised by the self-check (forward semantics equal).
# -----------------------------------------------------------------------------
def init_params(key, mfc, lc):
    c_in = mfc + lc
    c_mid = max(4, lc)

    def xavier(k, shape, fan_in, fan_out):
        bound = (6.0 / (fan_in + fan_out)) ** 0.5
        return jax.random.uniform(k, shape, jnp.float32, -bound, bound)

    k1, k2, k3, k4, k5, k6, k7 = jax.random.split(key, 7)
    w_o = xavier(k1, (3, 3, c_in, c_mid), c_in * 9, c_mid * 9)
    w_i = xavier(k2, (3, 3, c_in, c_mid), c_in * 9, c_mid * 9)
    w_o2 = xavier(k3, (3, 3, c_mid, c_mid), c_mid * 9, c_mid * 9)
    w_f = xavier(k4, (2 * c_mid, mfc), 2 * c_mid, mfc)
    b_o = 0.05 * jax.random.normal(k5, (c_mid,), jnp.float32)
    b_i = 0.05 * jax.random.normal(k6, (c_mid,), jnp.float32)
    b_o2 = 0.05 * jax.random.normal(k7, (c_mid,), jnp.float32)
    return (w_o, b_o, w_i, b_i, w_o2, b_o2, w_f)


# -----------------------------------------------------------------------------
# Pure-JAX reference (for correctness check).
# -----------------------------------------------------------------------------
def reference_forward(motion_field, layer, params, align_corners):
    w_o, b_o, w_i, b_i, w_o2, b_o2, w_f = params
    B, lc, H, W = layer.shape
    up = upsample_bilinear(motion_field.astype(jnp.float32), H, W, align_corners)
    up_nhwc = jnp.transpose(up, (0, 2, 3, 1))
    x = jnp.concatenate(
        [up_nhwc, jnp.transpose(layer.astype(jnp.float32), (0, 2, 3, 1))],
        axis=-1)

    def conv3(x, w, b):
        y = jax.lax.conv_general_dilated(
            x, w, (1, 1), "SAME", dimension_numbers=("NHWC", "HWIO", "NHWC"))
        return jax.nn.relu(y + b.reshape(1, 1, 1, -1))

    co = conv3(x, w_o, b_o)
    ci = conv3(x, w_i, b_i)
    co2 = conv3(ci, w_o2, b_o2)
    cat = jnp.concatenate([co, co2], axis=-1)
    out = jnp.einsum("bhwc,co->bhwo", cat, w_f) + up_nhwc
    return jnp.transpose(out, (0, 3, 1, 2))


if __name__ == "__main__":
    # Small shapes consistent with the module's forward.
    B = 2
    motion_field_channels = 2
    layer_channels = 4
    H = W = 16
    h0 = w0 = 8
    align_corners = False

    key = jax.random.PRNGKey(0)
    k_mf, k_layer, k_params = jax.random.split(key, 3)
    motion_field = jax.random.normal(k_mf, (B, motion_field_channels, h0, w0),
                                     jnp.float32)
    layer = jax.random.normal(k_layer, (B, layer_channels, H, W), jnp.float32)
    params = init_params(k_params, motion_field_channels, layer_channels)

    out = jax.block_until_ready(
        refine_motion_field(motion_field, layer, params, align_corners))
    ref = jax.block_until_ready(
        reference_forward(motion_field, layer, params, align_corners))

    assert out.shape == (B, motion_field_channels, H, W)
    assert jnp.allclose(out, ref, atol=1e-3, rtol=1e-3), \
        f"max abs err = {jnp.max(jnp.abs(out - ref))}"

    print("KERNEL_OK")
</pallas_src>

<mosaic_0001>
module attributes {stable_mosaic.version = 11 : i64} {
  func.func @refine_kernel(%arg0: i32, %arg1: i32, %arg2: memref<1x1x8x768xf32, #tpu.memory_space<vmem>>, %arg3: memref<1x3x768xf32, #tpu.memory_space<vmem>>, %arg4: memref<16x72xf32, #tpu.memory_space<vmem>>, %arg5: memref<16x1xf32, #tpu.memory_space<vmem>>, %arg6: memref<8x72xf32, #tpu.memory_space<vmem>>, %arg7: memref<8x1xf32, #tpu.memory_space<vmem>>, %arg8: memref<2x16xf32, #tpu.memory_space<vmem>>, %arg9: memref<1x2x256xf32, #tpu.memory_space<vmem>>, %arg10: memref<8x512xf32, #tpu.memory_space<vmem>>) attributes {dimension_semantics = [#tpu.dimension_semantics<parallel>, #tpu.dimension_semantics<parallel>], iteration_bounds = array<i64: 2, 1>, scalar_prefetch = 0 : i64, scratch_operands = 1 : i64, tpu.core_type = #tpu.core_type<tc>, window_params = [{transform_indices = @transform_0, window_bounds = array<i64: 1, 1, 8, 768>}, {transform_indices = @transform_1, window_bounds = array<i64: 1, 3, 768>}, {pipeline_mode = #tpu.pipeline_mode<synchronous>, transform_indices = @transform_2, window_bounds = array<i64: 16, 72>}, {pipeline_mode = #tpu.pipeline_mode<synchronous>, transform_indices = @transform_3, window_bounds = array<i64: 16, 1>}, {pipeline_mode = #tpu.pipeline_mode<synchronous>, transform_indices = @transform_4, window_bounds = array<i64: 8, 72>}, {pipeline_mode = #tpu.pipeline_mode<synchronous>, transform_indices = @transform_5, window_bounds = array<i64: 8, 1>}, {pipeline_mode = #tpu.pipeline_mode<synchronous>, transform_indices = @transform_6, window_bounds = array<i64: 2, 16>}, {transform_indices = @transform_7, window_bounds = array<i64: 1, 2, 256>}]} {
    %c0 = arith.constant 0 : index
    %c0_0 = arith.constant 0 : index
    %c0_1 = arith.constant 0 : index
    %c111 = arith.constant 111 : index
    %0 = vector.load %arg2[%c0, %c0_0, %c0_1, %c111] : memref<1x1x8x768xf32, #tpu.memory_space<vmem>>, vector<1x1x8x512xf32>
    %1 = vector.shape_cast %0 : vector<1x1x8x512xf32> to vector<8x512xf32>
    %c0_2 = arith.constant 0 : index
    %c0_3 = arith.constant 0 : index
    %c128 = arith.constant 128 : index
    %2 = vector.load %arg3[%c0_2, %c0_3, %c128] : memref<1x3x768xf32, #tpu.memory_space<vmem>>, vector<1x1x512xf32>
    %3 = vector.shape_cast %2 : vector<1x1x512xf32> to vector<1x512xf32>
    %4 = vector.broadcast %3 : vector<1x512xf32> to vector<8x512xf32>
    %5 = arith.mulf %1, %4 : vector<8x512xf32>
    %c0_4 = arith.constant 0 : index
    %c0_5 = arith.constant 0 : index
    %c0_6 = arith.constant 0 : index
    %c112 = arith.constant 112 : index
    %6 = vector.load %arg2[%c0_4, %c0_5, %c0_6, %c112] : memref<1x1x8x768xf32, #tpu.memory_space<vmem>>, vector<1x1x8x512xf32>
    %7 = vector.shape_cast %6 : vector<1x1x8x512xf32> to vector<8x512xf32>
    %c0_7 = arith.constant 0 : index
    %c0_8 = arith.constant 0 : index
    %c0_9 = arith.constant 0 : index
    %c113 = arith.constant 113 : index
    %8 = vector.load %arg2[%c0_7, %c0_8, %c0_9, %c113] : memref<1x1x8x768xf32, #tpu.memory_space<vmem>>, vector<1x1x8x512xf32>
    %9 = vector.shape_cast %8 : vector<1x1x8x512xf32> to vector<8x512xf32>
    %c0_10 = arith.constant 0 : index
    %c2 = arith.constant 2 : index
    %c128_11 = arith.constant 128 : index
    %10 = vector.load %arg3[%c0_10, %c2, %c128_11] : memref<1x3x768xf32, #tpu.memory_space<vmem>>, vector<1x1x512xf32>
    %11 = vector.shape_cast %10 : vector<1x1x512xf32> to vector<1x512xf32>
    %12 = vector.broadcast %11 : vector<1x512xf32> to vector<8x512xf32>
    %13 = arith.mulf %9, %12 : vector<8x512xf32>
    %c0_12 = arith.constant 0 : index
    %c0_13 = arith.constant 0 : index
    %c0_14 = arith.constant 0 : index
    %c127 = arith.constant 127 : index
    %14 = vector.load %arg2[%c0_12, %c0_13, %c0_14, %c127] : memref<1x1x8x768xf32, #tpu.memory_space<vmem>>, vector<1x1x8x512xf32>
    %15 = vector.shape_cast %14 : vector<1x1x8x512xf32> to vector<8x512xf32>
    %c0_15 = arith.constant 0 : index
    %c0_16 = arith.constant 0 : index
    %c128_17 = arith.constant 128 : index
    %16 = vector.load %arg3[%c0_15, %c0_16, %c128_17] : memref<1x3x768xf32, #tpu.memory_space<vmem>>, vector<1x1x512xf32>
    %17 = vector.shape_cast %16 : vector<1x1x512xf32> to vector<1x512xf32>
    %18 = vector.broadcast %17 : vector<1x512xf32> to vector<8x512xf32>
    %19 = arith.mulf %15, %18 : vector<8x512xf32>
    %c0_18 = arith.constant 0 : index
    %c0_19 = arith.constant 0 : index
    %c0_20 = arith.constant 0 : index
    %c128_21 = arith.constant 128 : index
    %20 = vector.load %arg2[%c0_18, %c0_19, %c0_20, %c128_21] : memref<1x1x8x768xf32, #tpu.memory_space<vmem>>, vector<1x1x8x512xf32>
    %21 = vector.shape_cast %20 : vector<1x1x8x512xf32> to vector<8x512xf32>
    %c0_22 = arith.constant 0 : index
    %c0_23 = arith.constant 0 : index
    %c0_24 = arith.constant 0 : index
    %c129 = arith.constant 129 : index
    %22 = vector.load %arg2[%c0_22, %c0_23, %c0_24, %c129] : memref<1x1x8x768xf32, #tpu.memory_space<vmem>>, vector<1x1x8x512xf32>
    %23 = vector.shape_cast %22 : vector<1x1x8x512xf32> to vector<8x512xf32>
    %c0_25 = arith.constant 0 : index
    %c2_26 = arith.constant 2 : index
    %c128_27 = arith.constant 128 : index
    %24 = vector.load %arg3[%c0_25, %c2_26, %c128_27] : memref<1x3x768xf32, #tpu.memory_space<vmem>>, vector<1x1x512xf32>
    %25 = vector.shape_cast %24 : vector<1x1x512xf32> to vector<1x512xf32>
    %26 = vector.broadcast %25 : vector<1x512xf32> to vector<8x512xf32>
    %27 = arith.mulf %23, %26 : vector<8x512xf32>
    %c0_28 = arith.constant 0 : index
    %c0_29 = arith.constant 0 : index
    %c0_30 = arith.constant 0 : index
    %c143 = arith.constant 143 : index
    %28 = vector.load %arg2[%c0_28, %c0_29, %c0_30, %c143] : memref<1x1x8x768xf32, #tpu.memory_space<vmem>>, vector<1x1x8x512xf32>
    %29 = vector.shape_cast %28 : vector<1x1x8x512xf32> to vector<8x512xf32>
    %c0_31 = arith.constant 0 : index
    %c0_32 = arith.constant 0 : index
    %c128_33 = arith.constant 128 : index
    %30 = vector.load %arg3[%c0_31, %c0_32, %c128_33] : memref<1x3x768xf32, #tpu.memory_space<vmem>>, vector<1x1x512xf32>
    %31 = vector.shape_cast %30 : vector<1x1x512xf32> to vector<1x512xf32>
    %32 = vector.broadcast %31 : vector<1x512xf32> to vector<8x512xf32>
    %33 = arith.mulf %29, %32 : vector<8x512xf32>
    %c0_34 = arith.constant 0 : index
    %c0_35 = arith.constant 0 : index
    %c0_36 = arith.constant 0 : index
    %c144 = arith.constant 144 : index
    %34 = vector.load %arg2[%c0_34, %c0_35, %c0_36, %c144] : memref<1x1x8x768xf32, #tpu.memory_space<vmem>>, vector<1x1x8x512xf32>
    %35 = vector.shape_cast %34 : vector<1x1x8x512xf32> to vector<8x512xf32>
    %c0_37 = arith.constant 0 : index
    %c0_38 = arith.constant 0 : index
    %c0_39 = arith.constant 0 : index
    %c145 = arith.constant 145 : index
    %36 = vector.load %arg2[%c0_37, %c0_38, %c0_39, %c145] : memref<1x1x8x768xf32, #tpu.memory_space<vmem>>, vector<1x1x8x512xf32>
    %37 = vector.shape_cast %36 : vector<1x1x8x512xf32> to vector<8x512xf32>
    %c0_40 = arith.constant 0 : index
    %c2_41 = arith.constant 2 : index
    %c128_42 = arith.constant 128 : index
    %38 = vector.load %arg3[%c0_40, %c2_41, %c128_42] : memref<1x3x768xf32, #tpu.memory_space<vmem>>, vector<1x1x512xf32>
    %39 = vector.shape_cast %38 : vector<1x1x512xf32> to vector<1x512xf32>
    %40 = vector.broadcast %39 : vector<1x512xf32> to vector<8x512xf32>
    %41 = arith.mulf %37, %40 : vector<8x512xf32>
    %42 = tpu.concatenate %5, %7, %13, %19, %21, %27, %33, %35, %41 in 0 : vector<8x512xf32>, vector<8x512xf32>, vector<8x512xf32>, vector<8x512xf32>, vector<8x512xf32>, vector<8x512xf32>, vector<8x512xf32>, vector<8x512xf32>, vector<8x512xf32> -> vector<72x512xf32>
    %c0_43 = arith.constant 0 : index
    %c0_44 = arith.constant 0 : index
    %43 = vector.load %arg4[%c0_43, %c0_44] : memref<16x72xf32, #tpu.memory_space<vmem>>, vector<16x72xf32>
    %cst = arith.constant dense<0.000000e+00> : vector<16x512xf32>
    %44 = tpu.matmul %43, %42, %cst {dimension_numbers = #tpu.dot_dimension_numbers<[1], [0], [0], [1], [0, 0, 1, 1], [], []>} : vector<16x72xf32>, vector<72x512xf32>, vector<16x512xf32> -> vector<16x512xf32>
    %c0_45 = arith.constant 0 : index
    %c0_46 = arith.constant 0 : index
    %45 = vector.load %arg5[%c0_45, %c0_46] : memref<16x1xf32, #tpu.memory_space<vmem>>, vector<16x1xf32>
    %46 = vector.broadcast %45 : vector<16x1xf32> to vector<16x512xf32>
    %47 = arith.addf %44, %46 : vector<16x512xf32>
    %cst_47 = arith.constant 0.000000e+00 : f32
    %48 = vector.broadcast %cst_47 : f32 to vector<16x512xf32>
    %49 = arith.maximumf %47, %48 : vector<16x512xf32>
    %c0_48 = arith.constant 0 : index
    %c1 = arith.constant 1 : index
    %c128_49 = arith.constant 128 : index
    %50 = vector.load %arg3[%c0_48, %c1, %c128_49] : memref<1x3x768xf32, #tpu.memory_space<vmem>>, vector<1x1x512xf32>
    %51 = vector.shape_cast %50 : vector<1x1x512xf32> to vector<1x512xf32>
    %52 = vector.extract_strided_slice %49 {offsets = [8, 0], sizes = [8, 512], strides = [1, 1]} : vector<16x512xf32> to vector<8x512xf32>
    %53 = vector.broadcast %51 : vector<1x512xf32> to vector<8x512xf32>
    %54 = arith.mulf %52, %53 : vector<8x512xf32>
    %c0_50 = arith.constant 0 : index
    %c0_51 = arith.constant 0 : index
    %55 = vector.load %arg10[%c0_50, %c0_51] : memref<8x512xf32, #tpu.memory_space<vmem>>, vector<8x512xf32>
    tpu.vector_store %arg10[%c0_50, %c0_51], %54 {strides = array<i32>} : memref<8x512xf32, #tpu.memory_space<vmem>>, vector<8x512xf32>,
    %c0_52 = arith.constant 0 : index
    %c111_53 = arith.constant 111 : index
    %56 = vector.load %arg10[%c0_52, %c111_53] : memref<8x512xf32, #tpu.memory_space<vmem>>, vector<8x256xf32>
    %c0_54 = arith.constant 0 : index
    %c0_55 = arith.constant 0 : index
    %c256 = arith.constant 256 : index
    %57 = vector.load %arg3[%c0_54, %c0_55, %c256] : memref<1x3x768xf32, #tpu.memory_space<vmem>>, vector<1x1x256xf32>
    %58 = vector.shape_cast %57 : vector<1x1x256xf32> to vector<1x256xf32>
    %59 = vector.broadcast %58 : vector<1x256xf32> to vector<8x256xf32>
    %60 = arith.mulf %56, %59 : vector<8x256xf32>
    %c0_56 = arith.constant 0 : index
    %c112_57 = arith.constant 112 : index
    %61 = vector.load %arg10[%c0_56, %c112_57] : memref<8x512xf32, #tpu.memory_space<vmem>>, vector<8x256xf32>
    %c0_58 = arith.constant 0 : index
    %c113_59 = arith.constant 113 : index
    %62 = vector.load %arg10[%c0_58, %c113_59] : memref<8x512xf32, #tpu.memory_space<vmem>>, vector<8x256xf32>
    %c0_60 = arith.constant 0 : index
    %c2_61 = arith.constant 2 : index
    %c256_62 = arith.constant 256 : index
    %63 = vector.load %arg3[%c0_60, %c2_61, %c256_62] : memref<1x3x768xf32, #tpu.memory_space<vmem>>, vector<1x1x256xf32>
    %64 = vector.shape_cast %63 : vector<1x1x256xf32> to vector<1x256xf32>
    %65 = vector.broadcast %64 : vector<1x256xf32> to vector<8x256xf32>
    %66 = arith.mulf %62, %65 : vector<8x256xf32>
    %c0_63 = arith.constant 0 : index
    %c127_64 = arith.constant 127 : index
    %67 = vector.load %arg10[%c0_63, %c127_64] : memref<8x512xf32, #tpu.memory_space<vmem>>, vector<8x256xf32>
    %c0_65 = arith.constant 0 : index
    %c0_66 = arith.constant 0 : index
    %c256_67 = arith.constant 256 : index
    %68 = vector.load %arg3[%c0_65, %c0_66, %c256_67] : memref<1x3x768xf32, #tpu.memory_space<vmem>>, vector<1x1x256xf32>
    %69 = vector.shape_cast %68 : vector<1x1x256xf32> to vector<1x256xf32>
    %70 = vector.broadcast %69 : vector<1x256xf32> to vector<8x256xf32>
    %71 = arith.mulf %67, %70 : vector<8x256xf32>
    %c0_68 = arith.constant 0 : index
    %c128_69 = arith.constant 128 : index
    %72 = vector.load %arg10[%c0_68, %c128_69] : memref<8x512xf32, #tpu.memory_space<vmem>>, vector<8x256xf32>
    %c0_70 = arith.constant 0 : index
    %c129_71 = arith.constant 129 : index
    %73 = vector.load %arg10[%c0_70, %c129_71] : memref<8x512xf32, #tpu.memory_space<vmem>>, vector<8x256xf32>
    %c0_72 = arith.constant 0 : index
    %c2_73 = arith.constant 2 : index
    %c256_74 = arith.constant 256 : index
    %74 = vector.load %arg3[%c0_72, %c2_73, %c256_74] : memref<1x3x768xf32, #tpu.memory_space<vmem>>, vector<1x1x256xf32>
    %75 = vector.shape_cast %74 : vector<1x1x256xf32> to vector<1x256xf32>
    %76 = vector.broadcast %75 : vector<1x256xf32> to vector<8x256xf32>
    %77 = arith.mulf %73, %76 : vector<8x256xf32>
    %c0_75 = arith.constant 0 : index
    %c143_76 = arith.constant 143 : index
    %78 = vector.load %arg10[%c0_75, %c143_76] : memref<8x512xf32, #tpu.memory_space<vmem>>, vector<8x256xf32>
    %c0_77 = arith.constant 0 : index
    %c0_78 = arith.constant 0 : index
    %c256_79 = arith.constant 256 : index
    %79 = vector.load %arg3[%c0_77, %c0_78, %c256_79] : memref<1x3x768xf32, #tpu.memory_space<vmem>>, vector<1x1x256xf32>
    %80 = vector.shape_cast %79 : vector<1x1x256xf32> to vector<1x256xf32>
    %81 = vector.broadcast %80 : vector<1x256xf32> to vector<8x256xf32>
    %82 = arith.mulf %78, %81 : vector<8x256xf32>
    %c0_80 = arith.constant 0 : index
    %c144_81 = arith.constant 144 : index
    %83 = vector.load %arg10[%c0_80, %c144_81] : memref<8x512xf32, #tpu.memory_space<vmem>>, vector<8x256xf32>
    %c0_82 = arith.constant 0 : index
    %c145_83 = arith.constant 145 : index
    %84 = vector.load %arg10[%c0_82, %c145_83] : memref<8x512xf32, #tpu.memory_space<vmem>>, vector<8x256xf32>
    %c0_84 = arith.constant 0 : index
    %c2_85 = arith.constant 2 : index
    %c256_86 = arith.constant 256 : index
    %85 = vector.load %arg3[%c0_84, %c2_85, %c256_86] : memref<1x3x768xf32, #tpu.memory_space<vmem>>, vector<1x1x256xf32>
    %86 = vector.shape_cast %85 : vector<1x1x256xf32> to vector<1x256xf32>
    %87 = vector.broadcast %86 : vector<1x256xf32> to vector<8x256xf32>
    %88 = arith.mulf %84, %87 : vector<8x256xf32>
    %89 = tpu.concatenate %60, %61, %66, %71, %72, %77, %82, %83, %88 in 0 : vector<8x256xf32>, vector<8x256xf32>, vector<8x256xf32>, vector<8x256xf32>, vector<8x256xf32>, vector<8x256xf32>, vector<8x256xf32>, vector<8x256xf32>, vector<8x256xf32> -> vector<72x256xf32>
    %c0_87 = arith.constant 0 : index
    %c0_88 = arith.constant 0 : index
    %90 = vector.load %arg6[%c0_87, %c0_88] : memref<8x72xf32, #tpu.memory_space<vmem>>, vector<8x72xf32>
    %cst_89 = arith.constant dense<0.000000e+00> : vector<8x256xf32>
    %91 = tpu.matmul %90, %89, %cst_89 {dimension_numbers = #tpu.dot_dimension_numbers<[1], [0], [0], [1], [0, 0, 1, 1], [], []>} : vector<8x72xf32>, vector<72x256xf32>, vector<8x256xf32> -> vector<8x256xf32>
    %c0_90 = arith.constant 0 : index
    %c0_91 = arith.constant 0 : index
    %92 = vector.load %arg7[%c0_90, %c0_91] : memref<8x1xf32, #tpu.memory_space<vmem>>, vector<8x1xf32>
    %93 = vector.broadcast %92 : vector<8x1xf32> to vector<8x256xf32>
    %94 = arith.addf %91, %93 : vector<8x256xf32>
    %cst_92 = arith.constant 0.000000e+00 : f32
    %95 = vector.broadcast %cst_92 : f32 to vector<8x256xf32>
    %96 = arith.maximumf %94, %95 : vector<8x256xf32>
    %97 = vector.extract_strided_slice %49 {offsets = [0, 128], sizes = [8, 256], strides = [1, 1]} : vector<16x512xf32> to vector<8x256xf32>
    %98 = tpu.concatenate %97, %96 in 0 : vector<8x256xf32>, vector<8x256xf32> -> vector<16x256xf32>
    %c0_93 = arith.constant 0 : index
    %c0_94 = arith.constant 0 : index
    %99 = vector.load %arg8[%c0_93, %c0_94] : memref<2x16xf32, #tpu.memory_space<vmem>>, vector<2x16xf32>
    %cst_95 = arith.constant dense<0.000000e+00> : vector<2x256xf32>
    %100 = tpu.matmul %99, %98, %cst_95 {dimension_numbers = #tpu.dot_dimension_numbers<[1], [0], [0], [1], [0, 0, 1, 1], [], []>} : vector<2x16xf32>, vector<16x256xf32>, vector<2x256xf32> -> vector<2x256xf32>
    %c0_96 = arith.constant 0 : index
    %c0_97 = arith.constant 0 : index
    %c0_98 = arith.constant 0 : index
    %c256_99 = arith.constant 256 : index
    %101 = vector.load %arg2[%c0_96, %c0_97, %c0_98, %c256_99] : memref<1x1x8x768xf32, #tpu.memory_space<vmem>>, vector<1x1x2x256xf32>
    %102 = vector.shape_cast %101 : vector<1x1x2x256xf32> to vector<2x256xf32>
    %103 = arith.addf %100, %102 : vector<2x256xf32>
    %c0_100 = arith.constant 0 : index
    %c0_101 = arith.constant 0 : index
    %c0_102 = arith.constant 0 : index
    %104 = vector.load %arg9[%c0_100, %c0_101, %c0_102] : memref<1x2x256xf32, #tpu.memory_space<vmem>>, vector<1x2x256xf32>
    %105 = vector.shape_cast %104 : vector<1x2x256xf32> to vector<2x256xf32>
    %106 = vector.shape_cast %103 : vector<2x256xf32> to vector<1x2x256xf32>
    tpu.vector_store %arg9[%c0_100, %c0_101, %c0_102], %106 {strides = array<i32>} : memref<1x2x256xf32, #tpu.memory_space<vmem>>, vector<1x2x256xf32>,
    return
  }
  func.func @transform_0(%arg0: i32, %arg1: i32) -> (i32, i32, i32, i32) {
    %c0_i32 = arith.constant 0 : i32
    %c0_i32_0 = arith.constant 0 : i32
    %c0_i32_1 = arith.constant 0 : i32
    return %arg0, %arg1, %c0_i32, %c0_i32_0 : i32, i32, i32, i32
  }
  func.func @transform_1(%arg0: i32, %arg1: i32) -> (i32, i32, i32) {
    %c0_i32 = arith.constant 0 : i32
    %c0_i32_0 = arith.constant 0 : i32
    %c0_i32_1 = arith.constant 0 : i32
    return %arg1, %c0_i32, %c0_i32_0 : i32, i32, i32
  }
  func.func @transform_2(%arg0: i32, %arg1: i32) -> (i32, i32) {
    %c0_i32 = arith.constant 0 : i32
    %c0_i32_0 = arith.constant 0 : i32
    %c0_i32_1 = arith.constant 0 : i32
    return %c0_i32, %c0_i32_0 : i32, i32
  }
  func.func @transform_3(%arg0: i32, %arg1: i32) -> (i32, i32) {
    %c0_i32 = arith.constant 0 : i32
    %c0_i32_0 = arith.constant 0 : i32
    %c0_i32_1 = arith.constant 0 : i32
    return %c0_i32, %c0_i32_0 : i32, i32
  }
  func.func @transform_4(%arg0: i32, %arg1: i32) -> (i32, i32) {
    %c0_i32 = arith.constant 0 : i32
    %c0_i32_0 = arith.constant 0 : i32
    %c0_i32_1 = arith.constant 0 : i32
    return %c0_i32, %c0_i32_0 : i32, i32
  }
  func.func @transform_5(%arg0: i32, %arg1: i32) -> (i32, i32) {
    %c0_i32 = arith.constant 0 : i32
    %c0_i32_0 = arith.constant 0 : i32
    %c0_i32_1 = arith.constant 0 : i32
    return %c0_i32, %c0_i32_0 : i32, i32
  }
  func.func @transform_6(%arg0: i32, %arg1: i32) -> (i32, i32) {
    %c0_i32 = arith.constant 0 : i32
    %c0_i32_0 = arith.constant 0 : i32
    %c0_i32_1 = arith.constant 0 : i32
    return %c0_i32, %c0_i32_0 : i32, i32
  }
  func.func @transform_7(%arg0: i32, %arg1: i32) -> (i32, i32, i32) {
    %c0_i32 = arith.constant 0 : i32
    %c0_i32_0 = arith.constant 0 : i32
    return %arg0, %c0_i32, %arg1 : i32, i32, i32
  }
}

</mosaic_0001>

<bundles_post_ra>
// kernel: tpu_custom_call.1
= control target key start
LH: loop header
LB: loop body
LE: loop exit
PB: predicated region body
PF: predicated region fallthrough
CT: control target
= control target key end

     0   :  { %12 = vsyncpa [#allocation4], 0  ;;  %s2835_s0 = inlined_call_operand.hbm [shape: f32[2,1,8,768], index: 0, kind: input, shape index: {}]   ;;  %s2836_s1 = inlined_call_operand.vmem [shape: f32[1,3,768], index: 1, kind: input, shape index: {}]   ;;  %s2837_s2 = inlined_call_operand.vmem [shape: f32[16,72], index: 2, kind: input, shape index: {}]   ;;  %s2838_s3 = inlined_call_operand.vmem [shape: f32[16,1], index: 3, kind: input, shape index: {}]   ;;  %s2839_s4 = inlined_call_operand.vmem [shape: f32[8,72], index: 4, kind: input, shape index: {}]   ;;  %s2840_s5 = inlined_call_operand.vmem [shape: f32[8,1], index: 5, kind: input, shape index: {}]   ;;  %s2841_s6 = inlined_call_operand.vmem [shape: f32[2,16], index: 6, kind: input, shape index: {}]   ;;  %s2842_s7 = inlined_call_operand.hbm [shape: f32[2,2,256], index: 7, kind: output, shape index: {}]  }
   0x1   :  { %14 = vsyncpa [#allocation4 + $0x1], 0 }
   0x2   :  { %15 = vsyncpa [#allocation5], 0 }
   0x3   :  { %17 = vsyncpa [#allocation5 + $0x1], 0  ;;  %s2193_s24 = smov 0   ;;  %s2195_s25 = smov 0  }
   0x4   :  { %s2197_s26 = smov 0   ;;  %s2199_s27 = smov 0  }
   0x5   :  { %s2201_s28 = smov 0   ;;  %s2203_s29 = smov 0  }
   0x6 LB: > { %s1599_s30 = sadd.s32 4294967295, %s2135_s29   ;;  %s1600_s8 = sadd.s32 4294967294, %s2135_s29   ;;  %s2135_s29 = sphi %s2203_s29, %s23_s29   ;;  %s2131_s28 = sphi %s2201_s28, %s2872_s28   ;;  %s2127_s27 = sphi %s2199_s27, %s2871_s27   ;;  %s2123_s26 = sphi %s2197_s26, %s2870_s26   ;;  %s2119_s25 = sphi %s2195_s25, %s2869_s25   ;;  %s2115_s24 = sphi %s2193_s24, %s2868_s24  }
   0x7   : > { %s35_s9 = sadd.s32 1, %s2131_s28  ;;  %s44_s10 = sadd.s32 1, %s2123_s26 }
   0x8   : > { %p37_p0 = scmp.ge.s32.totalorder %s35_s9, 2  ;;  %p51_p1 = scmp.ne.s32.totalorder %s2123_s26, %s2119_s25 }
   0x9   : > { %p52_p2 = scmp.eq.s32.totalorder %s2135_s29, 0  ;;  %p57_p3 = scmp.ne.s32.totalorder %s2119_s25, %s2115_s24 }
   0xa   : > { %s2874_s9 = smov (%p37_p0, %s35_s9), 0  ;;  %p58_p5 = scmp.eq.s32.totalorder %s1599_s30, 0 }
   0xb   : > { %2853 = sst [smem:[#allocation9_spill]] %s2874_s9  ;;  %p2234_p4 = por %p52_p2, %p51_p1 }
   0xc   : > { %s39_s12 = ssub.s32 %s2131_s28, %s2874_s9  ;;  %p214_p6 = scmp.eq.s32.totalorder %s1599_s30, 1 }
   0xd   : > { %p42_p7 = scmp.eq.s32.totalorder %s39_s12, 0  ;;  %p2240_p8 = por %p58_p5, %p57_p3 }
   0xe   : > { %p2244_p9 = por %p214_p6, %p51_p1  ;;  %p220_p10 = scmp.eq.s32.totalorder %s1600_s8, 1 }
   0xf   : > { %s2249_s15 = scalar_select %p42_p7, %s2123_s26, %s44_s10  }
  0x10   : > { %s2856_s14 = scalar_select %p2244_p9, 1, 0 }
  0x11   : > { %p2251_p11 = por %p220_p10, %p57_p3  ;;  %p1692_p13 = scmp.lt.s32.totalorder %s2135_s29, 2 }
  0x12   : > { %s263_s17 = sand.u32 1, %s2123_s26   ;;  %s1678_s19 = smul.u32 768, %s2131_s28 }
  0x13   : > { %s2857_s16 = scalar_select %p2251_p11, 1, 0 }
  0x14   : > { %s1677_s18 = smul.u32 48, %s263_s17  ;;  %p2261_p0 = pnand %p1692_p13, %p2234_p4 }
  0x15   : > { %s2269_s23 = scalar_lea.hbm %s2835_s0, %s1678_s19  ;;  %s264_s10 = scalar_lea.sflag [#allocation4], %s263_s17 }
  0x16   : > { %s267_s30 = scalar_lea.vmem [#allocation3], %s1677_s18  ;;  %s2023_s11 = scalar_lea.hbm %s2269_s23, 768 }
  0x17   : > { %s277_s8 = sshll.u32 %s267_s30, 4  ;;  %p2024_p2 = scmp.ne.s32.totalorder %s2269_s23, %s2023_s11  ;;  %s2271_s8 = int_to_ptr.vmem [resolvable:$true] %s277_s8 }
  0x18   : > { %p2025_p3 = pneg %p2261_p0  ;;  %s2028_s21 = scalar_lea.hbm %s2835_s0, 1536 }
  0x19   : > { %p2029_p6 = scmp.lt.u32.totalorder %s2269_s23, %s2835_s0  ;;  %p2030_p7 = scmp.lt.u32.totalorder %s2028_s21, %s2023_s11 }
  0x1a   : > { %p2026_p4 = pnand %p2025_p3, %p2024_p2  ;;  %p2032_p13 = scmp.lt.u32.totalorder %s2023_s11, %s2269_s23 }
  0x1b   : > { %p2031_p10 = por %p2030_p7, %p2029_p6 }
  0x1c   : > { %p2027_p5 = pneg %p2026_p4 }
  0x1d   : > { %p2033_p12 = por %p2032_p13, %p2031_p10 }
  0x1f   : > { %p2034_p1 = pnand %p2033_p12, %p2027_p5 }
  0x21   : > { %2037 = shalt.err (!%p2034_p1)
}
  0x22   : > { %s2038_s17 = scalar_lea.vmem %s2271_s8, 768  ;;  %s2137_s18 = smov [#allocation3]  }
  0x23   : > { %p2039_p2 = scmp.ne.s32.totalorder %s2271_s8, %s2038_s17  ;;  %s2043_s30 = sshll.u32 %s2137_s18, 4  ;;  %s2044_s30 = int_to_ptr.vmem [resolvable:$false] %s2043_s30 }
  0x24   : > { %s2045_s9 = scalar_lea.vmem %s2044_s30, 1536  ;;  %p2046_p9 = scmp.lt.s32.totalorder %s2271_s8, %s2044_s30 }
  0x25   : > { %p2041_p4 = pnand %p2039_p2, %p2025_p3  ;;  %p2047_p6 = scmp.lt.s32.totalorder %s2045_s9, %s2038_s17 }
  0x27   : > { %p2042_p11 = pneg %p2041_p4  ;;  %p2048_p7 = por %p2047_p6, %p2046_p9 }
  0x29   : > { %p2049_p10 = pnand %p2048_p7, %p2042_p11 }
  0x2b   : > { %2052 = shalt.err (!%p2049_p10)
}
  0x2c   : > { %1687 = dma.hbm_to_vmem [thread:$0]  (!%p2261_p0), %s2269_s23, 768, %s2271_s8, %s264_s10  }
  0x2d   : > { %p282_p12 = scmp.lt.s32.totalorder %s2135_s29, 3  ;;  %p2859_p1 = scmp.ge.s32.totalorder %s2135_s29, 1 }
  0x2f   : > { %p283_p3 = pnand %p2859_p1, %p282_p12 }
  0x30   : > { %s2302_s11 = sand.u32 (!%p283_p3), 1, %s2119_s25  }
  0x31   : > { %286 = sbr.rel (%p283_p3) target bundleno = 1435 (0x59b), region = 48  ;;  %s289_s19 = scalar_lea.sflag (!%p283_p3), [#allocation4], %s2302_s11 }
  0x32   : > { %s1679_s12 = smul.u32 (!%p283_p3), 48, %s2302_s11 }
  0x34   : > { %s2306_s21 = scalar_lea.vmem (!%p283_p3), [#allocation3], %s1679_s12 }
  0x38   : > { %2106 = dma.done.wait (%p2240_p8), %s289_s19, 768  }
  0x39   : > { %2108 = vsyncadd (%p2240_p8), %s289_s19, 4294966528  ;;  %v342_v0 = vlaneseq  ;;  %v1608_v6 = vld [vmem:[%s2836_s1 + $0x6] ss:$4 sm:$0xf]  ;;  %s2138_s13 = smov 113   ;;  %s2139_s22 = smov 127  }
  0x3a   : > { %v1607_v11 = vld [vmem:[%s2836_s1 + $0x4] ss:$4 sm:$0xf]  ;;  %s2140_s17 = smov 1   ;;  %s2141_s18 = smov 15   ;;  %vm407_vm0 = vcmask 924672  }
  0x3b   : > { %v343_v1 = vshrl.u32 %v342_v0, 7  ;;  %s2142_s30 = smov 17   ;;  %s2143_s9 = smov 111   ;;  %v2357_v16 = vld [vmem:[%s2306_s21 + $0x8] sm:$0xff]  ;;  %v2360_v17 = vld [vmem:[%s2306_s21 + $0x10] sm:$0xff]  ;;  %v2363_v18 = vld [vmem:[%s2306_s21] sm:$0xff] }
  0x3c   : > { %v2366_v19 = vld [vmem:[%s2306_s21 + $0x18] sm:$0xff]  ;;  %v1756_v20 = vpack.i.bf16 %v2360_v17, %v2357_v16  ;;  %v2377_v22 = vld [vmem:[%s2306_s21 + $0x20] sm:$0xff]  ;;  %s2144_s12 = smov 95   ;;  %v2387_v24 = vld [vmem:[%s2306_s21 + $0x28] sm:$0xff]  ;;  %s2851_s19 = smov 126   ;;  %vm429_vm1 = vcmask 1039360  }
  0x3d   : > { %v2312_v2 = vsub.s32 2, %v343_v1  ;;  %v2314_v3 = vsub.s32 0, %v343_v1  ;;  %v2316_v4 = vsub.s32 3, %v343_v1  ;;  %v2318_v5 = vsub.s32 1, %v343_v1  ;;  %s2146_s20 = smov 112   ;;  %s2849_s23 = smov 110  }
  0x3e   : > { %v1761_v21 = vpack.i.bf16 %v2363_v18, %v2366_v19  ;;  %v1771_v23 = vpack.i.bf16 %v2377_v22, %v2366_v19  ;;  %vm456_vm2 = vcmask 7168   ;;  %vm478_vm3 = vcmask 121856   ;;  %s2847_s8 = smov 96   ;;  %s2845_s10 = smov 94  }
  0x3f   : > { %v394_v7 = vrot.slane %v1608_v6, %v2312_v2  ;;  %v386_v8 = vrot.slane %v1608_v6, %v2314_v3  ;;  %v398_v9 = vrot.slane %v1608_v6, %v2316_v4  ;;  %v390_v10 = vrot.slane %v1608_v6, %v2318_v5  ;;  %p2864_p9 = scmp.ne.s32.totalorder %s2856_s14, 0 }
  0x40   : > { %v349_v12 = vrot.slane %v1607_v11, %v2318_v5  ;;  %v345_v13 = vrot.slane %v1607_v11, %v2314_v3  ;;  %v357_v14 = vrot.slane %v1607_v11, %v2316_v4  ;;  %v353_v15 = vrot.slane %v1607_v11, %v2312_v2 }
  0x41   : > { %403 = vrot.lane.b32.xlu1 %v394_v7, %s2138_s13  ;;  %399 = vrot.lane.b32.xlu0 %v386_v8, %s2138_s13  ;;  %vm500_vm4 = vcmask 138240   ;;  %vm366_vm5 = vcmask 908288   ;;  %vm639_vm6 = vcmask 777216   ;;  %vm548_vm7 = vcmask 1031168  }
  0x42   : > { %vm568_vm8 = vcmask 916480   ;;  %vm599_vm9 = vcmask 900096   ;;  %vm619_vm10 = vcmask 785408   ;;  %vm659_vm11 = vcmask 769024  }
  0x43   : > { %vm845_vm12 = vcmask 588800   ;;  %vm1396_vm13 = vcmask 130048  }
  0x45   : > { %405 = vrot.lane.b32.xlu1 %v398_v9, %s2138_s13  ;;  %401 = vrot.lane.b32.xlu0 %v390_v10, %s2138_s13 }
  0x49   : > { %423 = vrot.lane.b32.xlu1 %v349_v12, %s2139_s22  ;;  %421 = vrot.lane.b32.xlu0 %v345_v13, %s2139_s22 }
  0x4d   : > { %427 = vrot.lane.b32.xlu1 %v357_v14, %s2139_s22  ;;  %425 = vrot.lane.b32.xlu0 %v353_v15, %s2139_s22 }
  0x51   : > { %450 = vrot.lane.b32.xlu1 %v390_v10, %s2140_s17  ;;  %448 = vrot.lane.b32.xlu0 %v386_v8, %s2140_s17 }
  0x55   : > { %454 = vrot.lane.b32.xlu1 %v398_v9, %s2140_s17  ;;  %452 = vrot.lane.b32.xlu0 %v394_v7, %s2140_s17 }
  0x59   : > { %472 = vrot.lane.b32.xlu1 %v349_v12, %s2141_s18  ;;  %470 = vrot.lane.b32.xlu0 %v345_v13, %s2141_s18 }
  0x5d   : > { %476 = vrot.lane.b32.xlu1 %v357_v14, %s2141_s18  ;;  %474 = vrot.lane.b32.xlu0 %v353_v15, %s2141_s18 }
  0x61   : > { %494 = vrot.lane.b32.xlu1 %v390_v10, %s2142_s30  ;;  %492 = vrot.lane.b32.xlu0 %v386_v8, %s2142_s30 }
  0x65   : > { %496 = vrot.lane.b32.xlu0 %v394_v7, %s2142_s30  ;;  %498 = vrot.lane.b32.xlu1 %v398_v9, %s2142_s30 }
  0x69   : > { %358 = vrot.lane.b32.xlu0 %v345_v13, %s2143_s9  ;;  %360 = vrot.lane.b32.xlu1 %v349_v12, %s2143_s9 }
  0x6d   : > { %362 = vrot.lane.b32.xlu0 %v353_v15, %s2143_s9  ;;  %364 = vrot.lane.b32.xlu1 %v357_v14, %s2143_s9 }
  0x71   : > { %1757 = vrot.lane.b32.xlu0 %v1756_v20, %s2139_s22  ;;  %1762 = vrot.lane.b32.xlu1 %v1761_v21, %s2139_s22 }
  0x75   : > { %527 = vrot.lane.b32.xlu0 %v2377_v22, %s2139_s22  ;;  %1767 = vrot.lane.b32.xlu1 %v1756_v20, %s2143_s9 }
  0x79   : > { %1772 = vrot.lane.b32.xlu0 %v1771_v23, %s2143_s9  ;;  %1782 = vrot.lane.b32.xlu1 %v1771_v23, %s2144_s12 }
  0x7d   : > { %1777 = vrot.lane.b32.xlu0 %v1756_v20, %s2144_s12  ;;  %637 = vrot.lane.b32.xlu1 %v2387_v24, %s2144_s12 }
  0xb3   : > { %v404_v25 = vpop.permute.xlu1 %403  ;;  %v400_v26 = vpop.permute.xlu0 %399 }
  0xb4   : > { %v416_v9 = vmul.f32 %v400_v26, %v2363_v18 }
  0xb7   : > { %v406_v27 = vpop.permute.xlu1 %405  ;;  %v402_v28 = vpop.permute.xlu0 %401 }
  0xb8   : > { %v420_v29 = vmul.f32 %v406_v27, %v2377_v22  ;;  %v408_v37 = vsel %vm407_vm0, %v400_v26, %v402_v28  ;;  %v409_v38 = vsel %vm407_vm0, %v402_v28, %v404_v25  ;;  %v410_v52 = vsel %vm407_vm0, %v404_v25, %v406_v27 }
  0xb9   : > { %v417_v41 = vmul.f32 %v408_v37, %v2357_v16  ;;  %v418_v42 = vmul.f32 %v409_v38, %v2360_v17  ;;  %v419_v61 = vmul.f32 %v410_v52, %v2366_v19 }
  0xba   : > { %546 = vrot.lane.b32.xlu1 %v420_v29, %s2851_s19 }
  0xbb   : > { %v424_v30 = vpop.permute.xlu1 %423  ;;  %v2394_v31 = vpop.permute.xlu0 %421  ;;  %v1786_v49 = vpack.i.bf16 %v418_v42, %v417_v41  ;;  %v1791_v14 = vpack.i.bf16 %v416_v9, %v419_v61 }
  0xbc   : > { %v430_v45 = vsel %vm429_vm1, %v2394_v31, %v424_v30  ;;  %v438_v23 = vmul.f32 %v2394_v31, %v2363_v18 }
  0xbd   : > { %v439_v51 = vmul.f32 %v430_v45, %v2357_v16 }
  0xbf   : > { %v428_v32 = vpop.permute.xlu1 %427  ;;  %v426_v33 = vpop.permute.xlu0 %425 }
  0xc0   : > { %v442_v34 = vmul.f32 %v428_v32, %v2377_v22  ;;  %v431_v44 = vsel %vm429_vm1, %v424_v30, %v426_v33  ;;  %v432_v8 = vsel %vm429_vm1, %v426_v33, %v428_v32 }
  0xc1   : > { %v440_v48 = vmul.f32 %v431_v44, %v2360_v17  ;;  %v441_v12 = vmul.f32 %v432_v8, %v2366_v19 }
  0xc2   : > { %566 = vrot.lane.b32.xlu0 %v442_v34, %s2146_s20 }
  0xc3   : > { %v451_v35 = vpop.permute.xlu1 %450  ;;  %v449_v36 = vpop.permute.xlu0 %448  ;;  %v1796_v58 = vpack.i.bf16 %v440_v48, %v439_v51  ;;  %v1801_v32 = vpack.i.bf16 %v438_v23, %v441_v12 }
  0xc4   : > { %v457_v50 = vsel %vm456_vm2, %v449_v36, %v451_v35  ;;  %v465_v55 = vmul.f32 %v449_v36, %v2357_v16 }
  0xc5   : > { %v466_v56 = vmul.f32 %v457_v50, %v2360_v17 }
  0xc7   : > { %v455_v39 = vpop.permute.xlu1 %454  ;;  %v453_v40 = vpop.permute.xlu0 %452  ;;  %v1806_v7 = vpack.i.bf16 %v466_v56, %v465_v55 }
  0xc8   : > { %v469_v43 = vmul.f32 %v455_v39, %v2387_v24  ;;  %v458_v15 = vsel %vm456_vm2, %v451_v35, %v453_v40  ;;  %v459_v20 = vsel %vm456_vm2, %v453_v40, %v455_v39 }
  0xc9   : > { %v467_v28 = vmul.f32 %v458_v15, %v2366_v19  ;;  %v468_v29 = vmul.f32 %v459_v20, %v2377_v22 }
  0xca   : > { %597 = vrot.lane.b32.xlu1 %v469_v43, %s2849_s23 }
  0xcb   : > { %v473_v46 = vpop.permute.xlu1 %472  ;;  %v471_v47 = vpop.permute.xlu0 %470  ;;  %v1811_v38 = vpack.i.bf16 %v468_v29, %v467_v28 }
  0xcc   : > { %v479_v33 = vsel %vm478_vm3, %v471_v47, %v473_v46  ;;  %v487_v36 = vmul.f32 %v471_v47, %v2357_v16 }
  0xcd   : > { %v488_v37 = vmul.f32 %v479_v33, %v2360_v17 }
  0xce   : > { %1787 = vrot.lane.b32.xlu1 %v1786_v49, %s2851_s19 }
  0xcf   : > { %v477_v53 = vpop.permute.xlu1 %476  ;;  %v475_v54 = vpop.permute.xlu0 %474  ;;  %v1816_v42 = vpack.i.bf16 %v488_v37, %v487_v36 }
  0xd0   : > { %v491_v57 = vmul.f32 %v477_v53, %v2387_v24  ;;  %v480_v59 = vsel %vm478_vm3, %v473_v46, %v475_v54  ;;  %v481_v60 = vsel %vm478_vm3, %v475_v54, %v477_v53 }
  0xd1   : > { %v489_v0 = vmul.f32 %v480_v59, %v2366_v19  ;;  %v490_v1 = vmul.f32 %v481_v60, %v2377_v22 }
  0xd2   : > { %617 = vrot.lane.b32.xlu0 %v491_v57, %s2847_s8  ;;  %1797 = vrot.lane.b32.xlu1 %v1796_v58, %s2146_s20 }
  0xd3   : > { %v495_v62 = vpop.permute.xlu1 %494  ;;  %v493_v63 = vpop.permute.xlu0 %492  ;;  %v1821_v13 = vpack.i.bf16 %v490_v1, %v489_v0 }
  0xd4   : > { %v509_v6 = vmul.f32 %v493_v63, %v2357_v16  ;;  %v501_v21 = vsel %vm500_vm4, %v493_v63, %v495_v62 }
  0xd5   : > { %v510_v30 = vmul.f32 %v501_v21, %v2360_v17 }
  0xd6   : > { %649 = vrot.lane.b32.xlu0 %v509_v6, %s2845_s10  ;;  %1807 = vrot.lane.b32.xlu1 %v1806_v7, %s2849_s23 }
  0xd7   : > { %v497_v10 = vpop.permute.xlu0 %496  ;;  %v499_v11 = vpop.permute.xlu1 %498 }
  0xd8   : > { %v503_v25 = vsel %vm500_vm4, %v497_v10, %v499_v11  ;;  %v502_v39 = vsel %vm500_vm4, %v495_v62, %v497_v10  ;;  %v513_v53 = vmul.f32 %v499_v11, %v2387_v24 }
  0xd9   : > { %v512_v31 = vmul.f32 %v503_v25, %v2377_v22  ;;  %v511_v44 = vmul.f32 %v502_v39, %v2366_v19 }
  0xda   : > { %1822 = vrot.lane.b32.xlu1 %v1821_v13, %s2847_s8  ;;  %1792 = vrot.lane.b32.xlu0 %v1791_v14, %s2851_s19 }
  0xdb   : > { %v2436_v26 = vpop.permute.xlu0 %358  ;;  %v361_v27 = vpop.permute.xlu1 %360 }
  0xdc   : > { %v375_v33 = vmul.f32 %v2436_v26, %v2363_v18 }
  0xde   : > { %651 = vrot.lane.b32.xlu1 %v510_v30, %s2845_s10  ;;  %1802 = vrot.lane.b32.xlu0 %v1801_v32, %s2146_s20 }
  0xdf   : > { %v2445_v34 = vpop.permute.xlu0 %362  ;;  %v365_v35 = vpop.permute.xlu1 %364 }
  0xe0   : > { %v379_v62 = vmul.f32 %v365_v35, %v2377_v22  ;;  %v367_v22 = vsel %vm366_vm5, %v2436_v26, %v361_v27  ;;  %v368_v13 = vsel %vm366_vm5, %v361_v27, %v2445_v34  ;;  %v369_v30 = vsel %vm366_vm5, %v2445_v34, %v365_v35 }
  0xe1   : > { %v376_v28 = vmul.f32 %v367_v22, %v2357_v16  ;;  %v377_v29 = vmul.f32 %v368_v13, %v2360_v17 }
  0xe2   : > { %1812 = vrot.lane.b32.xlu0 %v1811_v38, %s2849_s23  ;;  %655 = vrot.lane.b32.xlu1 %v512_v31, %s2845_s10  ;;  %v378_v31 = vmul.f32 %v369_v30, %v2366_v19 }
  0xe3   : > { %v1758_v40 = vpop.permute.xlu0 %1757  ;;  %v1763_v41 = vpop.permute.xlu1 %1762  ;;  %v1861_v36 = vpack.i.bf16 %v377_v29, %v376_v28 }
  0xe4   : > { %v1764_v43 = vunpack.i.l.bf16 %v1763_v41  ;;  %v1760_v45 = vunpack.i.h.bf16 %v1758_v40  ;;  %v1759_v46 = vunpack.i.l.bf16 %v1758_v40  ;;  %v1765_v54 = vunpack.i.h.bf16 %v1763_v41 }
  0xe5   : > { %v1866_v16 = vpack.i.bf16 %v378_v31, %v375_v33 }
  0xe6   : > { %1817 = vrot.lane.b32.xlu0 %v1816_v42, %s2847_s8  ;;  %v530_v57 = vsel %vm429_vm1, %v1759_v46, %v1760_v45  ;;  %v531_v58 = vsel %vm429_vm1, %v1760_v45, %v1764_v43  ;;  %v529_v9 = vsel %vm429_vm1, %v1765_v54, %v1759_v46 }
  0xe7   : > { %v528_v47 = vpop.permute.xlu0 %527  ;;  %v1768_v48 = vpop.permute.xlu1 %1767  ;;  %v1826_v1 = vpack.i.bf16 %v531_v58, %v530_v57  ;;  %v1831_v20 = vpack.i.bf16 %v529_v9, %v379_v62 }
  0xe8   : > { %v1770_v49 = vunpack.i.h.bf16 %v1768_v48  ;;  %v1769_v50 = vunpack.i.l.bf16 %v1768_v48  ;;  %v532_v51 = vsel %vm429_vm1, %v1764_v43, %v528_v47 }
  0xe9   : > { %v1836_v52 = vpack.i.bf16 %v528_v47, %v532_v51 }
  0xea   : > { %653 = vrot.lane.b32.xlu0 %v511_v44, %s2845_s10  ;;  %v581_v61 = vsel %vm366_vm5, %v1769_v50, %v1770_v49 }
  0xeb   : > { %v1773_v55 = vpop.permute.xlu0 %1772  ;;  %1837 = vrot.lane.b32.xlu1 %v1836_v52, %s2142_s30  ;;  %v1783_v56 = vpop.permute.xlu1 %1782 }
  0xec   : > { %v1775_v59 = vunpack.i.h.bf16 %v1773_v55  ;;  %v1774_v60 = vunpack.i.l.bf16 %v1773_v55  ;;  %v1784_v0 = vunpack.i.l.bf16 %v1783_v56  ;;  %v1785_v8 = vunpack.i.h.bf16 %v1783_v56 }
  0xee   : > { %657 = vrot.lane.b32.xlu0 %v513_v53, %s2845_s10  ;;  %v583_v63 = vsel %vm366_vm5, %v1774_v60, %v1775_v59  ;;  %v582_v24 = vsel %vm366_vm5, %v1770_v49, %v1774_v60  ;;  %v642_v23 = vsel %vm639_vm6, %v1784_v0, %v1785_v8  ;;  %s2861_s10 = smov 110  }
  0xef   : > { %v1841_v6 = vpack.i.bf16 %v582_v24, %v581_v61  ;;  %v2465_v7 = vpop.permute.xlu0 %1777  ;;  %v1846_v12 = vpack.i.bf16 %v583_v63, %v1769_v50  ;;  %v638_v21 = vpop.permute.xlu1 %637 }
  0xf0   : > { %v1780_v10 = vunpack.i.h.bf16 %v2465_v7  ;;  %v1779_v11 = vunpack.i.l.bf16 %v2465_v7  ;;  %v643_v25 = vsel %vm639_vm6, %v1785_v8, %v638_v21 }
  0xf1   : > { %1842 = vrot.lane.b32.xlu1 %v1841_v6, %s2142_s30  ;;  %v1856_v32 = vpack.i.bf16 %v643_v25, %v642_v23 }
  0xf2   : > { %v640_v14 = vsel %vm639_vm6, %v1779_v11, %v1780_v10  ;;  %v641_v15 = vsel %vm639_vm6, %v1780_v10, %v1784_v0  ;;  %1827 = vrot.lane.b32.xlu0 %v1826_v1, %s2142_s30 }
  0xf3   : > { %v1851_v27 = vpack.i.bf16 %v641_v15, %v640_v14 }
  0xf5   : > { %1847 = vrot.lane.b32.xlu1 %v1846_v12, %s2142_s30 }
  0xf6   : > { %1832 = vrot.lane.b32.xlu0 %v1831_v20, %s2142_s30 }
  0xf9   : > { %1852 = vrot.lane.b32.xlu1 %v1851_v27, %s2142_s30 }
  0xfa   : > { %1857 = vrot.lane.b32.xlu0 %v1856_v32, %s2142_s30 }
  0xfd   : > { %1862 = vrot.lane.b32.xlu1 %v1861_v36, %s2142_s30 }
 0x101   : > { %1867 = vrot.lane.b32.xlu1 %v1866_v16, %s2142_s30 }
 0x12c   : > { %v547_v17 = vpop.permute.xlu1 %546 }
 0x134   : > { %v567_v35 = vpop.permute.xlu0 %566 }
 0x13c   : > { %v598_v34 = vpop.permute.xlu1 %597 }
 0x140   : > { %v1788_v37 = vpop.permute.xlu1 %1787 }
 0x141   : > { %v1790_v26 = vunpack.i.h.bf16 %v1788_v37  ;;  %v1789_v41 = vunpack.i.l.bf16 %v1788_v37  ;;  %v2150_v37 = vmov 0.0  }
 0x142   : > { %916 = vmatprep.mubr.f32.mxu0 %v2150_v37  ;;  %992 = vmatprep.mubr.f32.mxu1 %v2150_v37 }
 0x143   : > { %v550_v49 = vsel %vm548_vm7, %v1789_v41, %v1790_v26 }
 0x144   : > { %v618_v38 = vpop.permute.xlu0 %617  ;;  %v1798_v39 = vpop.permute.xlu1 %1797 }
 0x145   : > { %v1800_v46 = vunpack.i.h.bf16 %v1798_v39  ;;  %v1799_v47 = vunpack.i.l.bf16 %v1798_v39 }
 0x147   : > { %v570_v57 = vsel %vm568_vm8, %v1799_v47, %v1800_v46 }
 0x148   : > { %v2495_v40 = vpop.permute.xlu0 %649  ;;  %v1808_v18 = vpop.permute.xlu1 %1807 }
 0x149   : > { %v1809_v19 = vunpack.i.l.bf16 %v1808_v18  ;;  %763 = vrot.lane.b32.xlu1 %v2495_v40, %s2142_s30  ;;  %v1810_v6 = vunpack.i.h.bf16 %v1808_v18 }
 0x14b   : > { %v1871_v42 = vpack.i.bf16 %v1809_v19, %v1775_v59  ;;  %v600_v25 = vsel %vm599_vm9, %v1809_v19, %v1810_v6 }
 0x14c   : > { %v1793_v43 = vpop.permute.xlu0 %1792  ;;  %v1823_v48 = vpop.permute.xlu1 %1822 }
 0x14d   : > { %v1795_v44 = vunpack.i.h.bf16 %v1793_v43  ;;  %v1794_v45 = vunpack.i.l.bf16 %v1793_v43  ;;  %1872 = vrot.lane.b32.xlu0 %v1871_v42, %s2142_s30  ;;  %v1825_v8 = vunpack.i.h.bf16 %v1823_v48  ;;  %v1824_v23 = vunpack.i.l.bf16 %v1823_v48 }
 0x14f   : > { %v551_v50 = vsel %vm548_vm7, %v1790_v26, %v1794_v45  ;;  %v549_v55 = vsel %vm548_vm7, %v1795_v44, %v1789_v41  ;;  %v552_v56 = vsel %vm548_vm7, %v1794_v45, %v547_v17  ;;  %v623_v32 = vsel %vm619_vm10, %v1825_v8, %v618_v38 }
 0x150   : > { %v1803_v51 = vpop.permute.xlu0 %1802  ;;  %v1876_v52 = vpack.i.bf16 %v551_v50, %v550_v49  ;;  %v1886_v60 = vpack.i.bf16 %v552_v56, %v549_v55  ;;  %v652_v62 = vpop.permute.xlu1 %651  ;;  %v1921_v16 = vpack.i.bf16 %v1779_v11, %v623_v32  ;;  %v2151_v44 = vmov 0  }
 0x151   : > { %v1805_v53 = vunpack.i.h.bf16 %v1803_v51  ;;  %v1804_v54 = vunpack.i.l.bf16 %v1803_v51  ;;  %v660_v7 = vsel %vm659_vm11, %v2495_v40, %v652_v62  ;;  %v1615_v40 = vld [vmem:[%s2836_s1 + $0xa] ss:$4 sm:$0x3]  ;;  %1926 = vset.pattern.permute.xlu0 %v2151_v44  ;;  %2022 = vset.pattern.permute.xlu1 %v2151_v44 }
 0x152   : > { %1877 = vrot.lane.b32.xlu0 %v1876_v52, %s2142_s30 }
 0x153   : > { %v571_v58 = vsel %vm568_vm8, %v1800_v46, %v1804_v54  ;;  %v572_v0 = vsel %vm568_vm8, %v1804_v54, %v567_v35  ;;  %v569_v1 = vsel %vm568_vm8, %v1805_v53, %v1799_v47  ;;  %v1072_v47 = vrot.slane %v1615_v40, %v2314_v3 }
 0x154   : > { %v1813_v59 = vpop.permute.xlu0 %1812  ;;  %v1881_v61 = vpack.i.bf16 %v571_v58, %v570_v57  ;;  %v1896_v10 = vpack.i.bf16 %v567_v35, %v572_v0  ;;  %v1891_v22 = vpack.i.bf16 %v569_v1, %v547_v17  ;;  %v656_v21 = vpop.permute.xlu1 %655  ;;  %v622_v17 = vsel %vm619_vm10, %v1824_v23, %v1825_v8  ;;  %v667_v57 = vld [vmem:[%s2838_s3 + $0x8] sm:$0xff] }
 0x155   : > { %v1815_v63 = vunpack.i.h.bf16 %v1813_v59  ;;  %v1814_v24 = vunpack.i.l.bf16 %v1813_v59  ;;  %v1076_v53 = vrot.slane %v1615_v40, %v2318_v5  ;;  %v1614_v58 = vld [vmem:[%s2836_s1 + $0x8] ss:$4 sm:$0x3] }
 0x156   : > { %1887 = vrot.lane.b32.xlu0 %v1886_v60, %s2142_s30  ;;  %1882 = vrot.lane.b32.xlu1 %v1881_v61, %s2142_s30  ;;  %v1050_v0 = vrot.slane %v1614_v58, %v2314_v3  ;;  %v1054_v1 = vrot.slane %v1614_v58, %v2318_v5 }
 0x157   : > { %v601_v12 = vsel %vm599_vm9, %v1810_v6, %v1814_v24  ;;  %v602_v15 = vsel %vm599_vm9, %v1814_v24, %v1815_v63  ;;  %v603_v20 = vsel %vm599_vm9, %v1815_v63, %v598_v34 }
 0x158   : > { %v1818_v9 = vpop.permute.xlu0 %1817  ;;  %v1901_v28 = vpack.i.bf16 %v601_v12, %v600_v25  ;;  %v1906_v29 = vpack.i.bf16 %v603_v20, %v602_v15 }
 0x159   : > { %v1820_v13 = vunpack.i.h.bf16 %v1818_v9  ;;  %v1819_v14 = vunpack.i.l.bf16 %v1818_v9 }
 0x15a   : > { %1897 = vrot.lane.b32.xlu0 %v1896_v10, %s2142_s30  ;;  %1892 = vrot.lane.b32.xlu1 %v1891_v22, %s2142_s30 }
 0x15b   : > { %v620_v27 = vsel %vm619_vm10, %v1819_v14, %v1820_v13  ;;  %v621_v30 = vsel %vm619_vm10, %v1820_v13, %v1824_v23  ;;  %v1916_v38 = vpack.i.bf16 %v622_v17, %v1819_v14 }
 0x15c   : > { %v654_v31 = vpop.permute.xlu0 %653  ;;  %v1911_v36 = vpack.i.bf16 %v621_v30, %v620_v27 }
 0x15d   : > { %v2520_v33 = vpop.permute.xlu1 %1837  ;;  %v661_v43 = vsel %vm659_vm11, %v652_v62, %v654_v31  ;;  %v662_v51 = vsel %vm659_vm11, %v654_v31, %v656_v21 }
 0x15e   : > { %1902 = vrot.lane.b32.xlu0 %v1901_v28, %s2142_s30  ;;  %1907 = vrot.lane.b32.xlu1 %v1906_v29, %s2142_s30  ;;  %v1840_v54 = vunpack.i.h.bf16 %v2520_v33  ;;  %v1839_v55 = vunpack.i.l.bf16 %v2520_v33 }
 0x160   : > { %v658_v34 = vpop.permute.xlu0 %657  ;;  %v780_v9 = vsel %vm500_vm4, %v1839_v55, %v1840_v54 }
 0x161   : > { %v663_v18 = vsel %vm659_vm11, %v656_v21, %v658_v34 }
 0x162   : > { %1912 = vrot.lane.b32.xlu0 %v1911_v36, %s2142_s30  ;;  %1922 = vrot.lane.b32.xlu1 %v1921_v16, %s2142_s30 }
 0x163   : > { %v2529_v35 = vpop.permute.xlu1 %1842 }
 0x164   : > { %v1845_v11 = vunpack.i.h.bf16 %v2529_v35  ;;  %v1844_v39 = vunpack.i.l.bf16 %v2529_v35  ;;  %v1828_v26 = vpop.permute.xlu0 %1827 }
 0x165   : > { %v1830_v49 = vunpack.i.h.bf16 %v1828_v26  ;;  %v1829_v50 = vunpack.i.l.bf16 %v1828_v26 }
 0x166   : > { %1917 = vrot.lane.b32.xlu0 %v1916_v38, %s2142_s30  ;;  %765 = vrot.lane.b32.xlu1 %v660_v7, %s2142_s30 }
 0x167   : > { %v2540_v19 = vpop.permute.xlu1 %1847  ;;  %v778_v62 = vsel %vm500_vm4, %v1829_v50, %v1830_v49  ;;  %v779_v13 = vsel %vm500_vm4, %v1830_v49, %v1839_v55 }
 0x168   : > { %v1850_v41 = vunpack.i.h.bf16 %v2540_v19  ;;  %v1849_v42 = vunpack.i.l.bf16 %v2540_v19  ;;  %v1833_v52 = vpop.permute.xlu0 %1832 }
 0x169   : > { %v1835_v61 = vunpack.i.h.bf16 %v1833_v52  ;;  %v1834_v63 = vunpack.i.l.bf16 %v1833_v52 }
 0x16a   : > { %767 = vrot.lane.b32.xlu0 %v661_v43, %s2142_s30  ;;  %771 = vrot.lane.b32.xlu1 %v663_v18, %s2142_s30  ;;  %v2553_v45 = vsel %vm500_vm4, %v1849_v42, %v1844_v39  ;;  %v2560_v46 = vsel %vm500_vm4, %v1845_v11, %v1850_v41 }
 0x16b   : > { %v2563_v48 = vpop.permute.xlu1 %1852  ;;  %v777_v12 = vsel %vm500_vm4, %v1835_v61, %v1829_v50 }
 0x16c   : > { %v2598_v28 = vpop.permute.xlu0 %1857 }
 0x16e   : > { %769 = vrot.lane.b32.xlu0 %v662_v51, %s2142_s30  ;;  %1077 = vrot.lane.b32.xlu1 %v1072_v47, %s2138_s13 }
 0x16f   : > { %v1863_v56 = vpop.permute.xlu1 %1862 }
 0x170   : > { %v1865_v59 = vunpack.i.h.bf16 %v1863_v56  ;;  %v1864_v60 = vunpack.i.l.bf16 %v1863_v56 }
 0x172   : > { %v774_v24 = vsel %vm500_vm4, %v1864_v60, %v1865_v59  ;;  %675 = vperm.xlu0 %1926, %v667_v57   ;;  %1079 = vrot.lane.b32.xlu1 %v1076_v53, %s2138_s13  ;;  %s2863_s13 = smov 94  }
 0x173   : > { %v1868_v6 = vpop.permute.xlu1 %1867  ;;  %v1625_v8 = vpack.c.bf16 %v778_v62, %v774_v24 }
 0x174   : > { %v1870_v10 = vunpack.i.h.bf16 %v1868_v6  ;;  %v1869_v22 = vunpack.i.l.bf16 %v1868_v6  ;;  %v1855_v6 = vunpack.i.h.bf16 %v2563_v48 }
 0x175   : > { %1626 = vmatprep.subr.bf16.mxu0 %v1625_v8  ;;  %v1854_v8 = vunpack.i.l.bf16 %v2563_v48 }
 0x176   : > { %v776_v14 = vsel %vm500_vm4, %v1870_v10, %v1834_v63  ;;  %v773_v15 = vsel %vm500_vm4, %v1869_v22, %v1864_v60  ;;  %v775_v20 = vsel %vm500_vm4, %v1865_v59, %v1870_v10  ;;  %1088 = vrot.lane.b32.xlu0 %v1050_v0, %s2139_s22  ;;  %1090 = vrot.lane.b32.xlu1 %v1054_v1, %s2139_s22 }
 0x177   : > { %v1641_v21 = vpack.c.bf16 %v780_v9, %v776_v14  ;;  %v1627_v23 = vpack.c.bf16 %v777_v12, %v773_v15  ;;  %v1643_v25 = vpack.c.bf16 %v779_v13, %v775_v20  ;;  %v790_v9 = vsel %vm500_vm4, %v1844_v39, %v1845_v11 }
 0x179   : > { %1642 = vmatprep.subr.bf16.mxu1 %v1641_v21  ;;  %1628 = vmatpush1.bf16.msra.mxu0 %v1627_v23  ;;  %v1859_v23 = vunpack.i.l.bf16 %v2598_v28 }
 0x17a   : > { %1644 = vmatpush1.bf16.msra.mxu1 %v1643_v25  ;;  %1102 = vrot.lane.b32.xlu0 %v1072_v47, %s2140_s17 }
 0x17b   : > { %1104 = vrot.lane.b32.xlu1 %v1076_v53, %s2140_s17 }
 0x17e   : > { %1113 = vrot.lane.b32.xlu0 %v1050_v0, %s2141_s18 }
 0x17f   : > { %1115 = vrot.lane.b32.xlu1 %v1054_v1, %s2141_s18 }
 0x182   : > { %1124 = vrot.lane.b32.xlu0 %v1072_v47, %s2142_s30 }
 0x183   : > { %1126 = vrot.lane.b32.xlu1 %v1076_v53, %s2142_s30 }
 0x186   : > { %1055 = vrot.lane.b32.xlu0 %v1050_v0, %s2143_s9 }
 0x187   : > { %1057 = vrot.lane.b32.xlu1 %v1054_v1, %s2143_s9 }
 0x1bb   : > { %v2600_v27 = vpop.permute.xlu1 %763 }
 0x1bf   : > { %v1873_v29 = vpop.permute.xlu0 %1872 }
 0x1c0   : > { %v1874_v50 = vunpack.i.l.bf16 %v1873_v29  ;;  %v1875_v57 = vunpack.i.h.bf16 %v1873_v29 }
 0x1c2   : > { %v792_v10 = vsel %vm500_vm4, %v1850_v41, %v1874_v50  ;;  %v1860_v41 = vunpack.i.h.bf16 %v2598_v28  ;;  %v803_v28 = vsel %vm500_vm4, %v1855_v6, %v1859_v23 }
 0x1c4   : > { %v1878_v30 = vpop.permute.xlu0 %1877 }
 0x1c5   : > { %v1880_v32 = vunpack.i.h.bf16 %v1878_v30  ;;  %v1879_v33 = vunpack.i.l.bf16 %v1878_v30  ;;  %v802_v30 = vsel %vm500_vm4, %v1854_v8, %v1855_v6  ;;  %v1613_v6 = vld [vmem:[%s2836_s1 + $0x5] ss:$4 sm:$0xf] }
 0x1c7   : > { %v782_v7 = vsel %vm500_vm4, %v1879_v33, %v1880_v32 }
 0x1c8   : > { %v1888_v31 = vpop.permute.xlu0 %1887  ;;  %v1883_v36 = vpop.permute.xlu1 %1882 }
 0x1c9   : > { %v1885_v16 = vunpack.i.h.bf16 %v1883_v36  ;;  %v1884_v17 = vunpack.i.l.bf16 %v1883_v36  ;;  %v1890_v34 = vunpack.i.h.bf16 %v1888_v31  ;;  %v1889_v38 = vunpack.i.l.bf16 %v1888_v31 }
 0x1cb   : > { %v786_v18 = vsel %vm500_vm4, %v1884_v17, %v1885_v16  ;;  %v781_v51 = vsel %vm500_vm4, %v1889_v38, %v1879_v33  ;;  %v783_v52 = vsel %vm500_vm4, %v1880_v32, %v1890_v34 }
 0x1cc   : > { %v1898_v26 = vpop.permute.xlu0 %1897  ;;  %v1893_v42 = vpop.permute.xlu1 %1892  ;;  %v1629_v40 = vpack.c.bf16 %v786_v18, %v782_v7 }
 0x1cd   : > { %v1900_v43 = vunpack.i.h.bf16 %v1898_v26  ;;  %v1899_v44 = vunpack.i.l.bf16 %v1898_v26  ;;  %v1895_v47 = vunpack.i.h.bf16 %v1893_v42  ;;  %v1894_v49 = vunpack.i.l.bf16 %v1893_v42 }
 0x1ce   : > { %1630 = vmatprep.subr.bf16.mxu0 %v1629_v40 }
 0x1cf   : > { %v785_v53 = vsel %vm500_vm4, %v1895_v47, %v1884_v17  ;;  %v784_v54 = vsel %vm500_vm4, %v1890_v34, %v1894_v49  ;;  %v788_v55 = vsel %vm500_vm4, %v1899_v44, %v1900_v43  ;;  %v787_v56 = vsel %vm500_vm4, %v1885_v16, %v1899_v44  ;;  %v664_v49 = vld [vmem:[%s2837_s2] sm:$0xff] }
 0x1d0   : > { %v1903_v58 = vpop.permute.xlu0 %1902  ;;  %v1908_v59 = vpop.permute.xlu1 %1907  ;;  %v1631_v60 = vpack.c.bf16 %v785_v53, %v781_v51  ;;  %v1645_v61 = vpack.c.bf16 %v788_v55, %v784_v54  ;;  %v1647_v62 = vpack.c.bf16 %v787_v56, %v783_v52  ;;  %v804_v16 = vsel %vm500_vm4, %v1859_v23, %v1860_v41  ;;  %v665_v53 = vld [vmem:[%s2837_s2 + $0x8] sm:$0xff] }
 0x1d1   : > { %v1905_v63 = vunpack.i.h.bf16 %v1903_v58  ;;  %v1904_v24 = vunpack.i.l.bf16 %v1903_v58  ;;  %v1910_v0 = vunpack.i.h.bf16 %v1908_v59  ;;  %v1909_v1 = vunpack.i.l.bf16 %v1908_v59 }
 0x1d2   : > { %1632 = vmatpush1.bf16.msra.mxu0 %v1631_v60  ;;  %1646 = vmatprep.subr.bf16.mxu1 %v1645_v61 }
 0x1d3   : > { %1648 = vmatpush1.bf16.msra.mxu1 %v1647_v62  ;;  %v794_v22 = vsel %vm500_vm4, %v1904_v24, %v1905_v63  ;;  %v796_v12 = vsel %vm500_vm4, %v1909_v1, %v1910_v0  ;;  %v793_v13 = vsel %vm500_vm4, %v1875_v57, %v1904_v24  ;;  %v795_v48 = vsel %vm500_vm4, %v1905_v63, %v1909_v1 }
 0x1d4   : > { %v1913_v14 = vpop.permute.xlu0 %1912  ;;  %v1923_v15 = vpop.permute.xlu1 %1922  ;;  %v1633_v20 = vpack.c.bf16 %v794_v22, %v790_v9  ;;  %v1649_v21 = vpack.c.bf16 %v796_v12, %v792_v10  ;;  %v1635_v35 = vpack.c.bf16 %v793_v13, %v2553_v45  ;;  %v1651_v11 = vpack.c.bf16 %v795_v48, %v2560_v46 }
 0x1d5   : > { %v1915_v39 = vunpack.i.h.bf16 %v1913_v14  ;;  %v1914_v19 = vunpack.i.l.bf16 %v1913_v14  ;;  %v1925_v25 = vunpack.i.h.bf16 %v1923_v15  ;;  %v1924_v45 = vunpack.i.l.bf16 %v1923_v15 }
 0x1d6   : > { %1634 = vmatprep.subr.bf16.mxu0 %v1633_v20  ;;  %1650 = vmatprep.subr.bf16.mxu1 %v1649_v21  ;;  %v1016_v22 = vrot.slane %v1613_v6, %v2314_v3  ;;  %v1020_v14 = vrot.slane %v1613_v6, %v2318_v5  ;;  %v1024_v20 = vrot.slane %v1613_v6, %v2312_v2 }
 0x1d7   : > { %1636 = vmatpush1.bf16.msra.mxu0 %v1635_v35  ;;  %1652 = vmatpush1.bf16.msra.mxu1 %v1651_v11  ;;  %v798_v29 = vsel %vm500_vm4, %v1914_v19, %v1915_v39  ;;  %v801_v34 = vsel %vm500_vm4, %v1925_v25, %v1854_v8 }
 0x1d8   : > { %v1918_v32 = vpop.permute.xlu0 %1917  ;;  %v1637_v33 = vpack.c.bf16 %v802_v30, %v798_v29  ;;  %v766_v36 = vpop.permute.xlu1 %765 }
 0x1d9   : > { %v1920_v31 = vunpack.i.h.bf16 %v1918_v32  ;;  %v1919_v46 = vunpack.i.l.bf16 %v1918_v32  ;;  %v805_v50 = vsel %vm500_vm4, %v2600_v27, %v766_v36 }
 0x1da   : > { %1638 = vmatprep.subr.bf16.mxu0 %v1637_v33 }
 0x1db   : > { %v797_v17 = vsel %vm500_vm4, %v1919_v46, %v1914_v19  ;;  %v800_v38 = vsel %vm500_vm4, %v1920_v31, %v1924_v45  ;;  %v799_v7 = vsel %vm500_vm4, %v1915_v39, %v1920_v31 }
 0x1dc   : > { %v768_v18 = vpop.permute.xlu0 %767  ;;  %v1639_v26 = vpack.c.bf16 %v801_v34, %v797_v17  ;;  %v1653_v42 = vpack.c.bf16 %v804_v16, %v800_v38  ;;  %v1655_v40 = vpack.c.bf16 %v803_v28, %v799_v7  ;;  %v772_v44 = vpop.permute.xlu1 %771 }
 0x1dd   : > { %v806_v43 = vsel %vm500_vm4, %v766_v36, %v768_v18 }
 0x1de   : > { %1640 = vmatpush1.bf16.msra.mxu0 %v1639_v26  ;;  %1654 = vmatprep.subr.bf16.mxu1 %v1653_v42 }
 0x1df   : > { %868 = vmatprep.subr.mxu0 %v806_v43  ;;  %1656 = vmatpush1.bf16.msra.mxu1 %v1655_v40 }
 0x1e0   : > { %v770_v47 = vpop.permute.xlu0 %769  ;;  %v2655_v27 = vpop.permute.xlu1 %1077 }
 0x1e1   : > { %v808_v51 = vsel %vm500_vm4, %v770_v47, %v772_v44  ;;  %v807_v52 = vsel %vm500_vm4, %v768_v18, %v770_v47 }
 0x1e2   : > { %869 = vmatpush1.msra.mxu0 %v805_v50  ;;  %944 = vmatprep.subr.mxu1 %v808_v51 }
 0x1e3   : > { %1609 = vmatmul.mubr.msk.f32.vlgmr.msra.gmra.mrb[0].mxu0 %vm845_vm12, %v664_v49  ;;  %945 = vmatpush1.msra.mxu1 %v807_v52 }
 0x1e4   : > { %1611 = vmatmul.mubr.msk.f32.vlgmr.msra.gmra.mrb[0].mxu1 %vm845_vm12, %v664_v49  ;;  %921 = vmatprep.mubr.f32.mxu0 %v2150_v37  ;;  %v1080_v55 = vpop.permute.xlu1 %1079  ;;  %v1028_v49 = vrot.slane %v1613_v6, %v2316_v4 }
 0x1e5   : > { %997 = vmatprep.mubr.f32.mxu1 %v2150_v37  ;;  %v1081_v30 = vsel %vm407_vm0, %v2655_v27, %v1080_v55 }
 0x1e7   : > { %1610 = vmatmul.mubr.msk.f32.gmra.mrb[2].mxu0 %vm845_vm12, %v665_v53 }
 0x1e8   : > { %1612 = vmatmul.mubr.msk.f32.gmra.mrb[2].mxu1 %vm845_vm12, %v665_v53  ;;  %1384 = vmatprep.mubr.f32.mxu0 %v2150_v37  ;;  %v1091_v57 = vpop.permute.xlu1 %1090 }
 0x1e9   : > { %1464 = vmatprep.mubr.f32.mxu1 %v2150_v37 }
 0x1ed   : > { %v2657_v59 = vpop.permute.xlu1 %1104 }
 0x1f1   : > { %v676_v54 = vpop.permute.xlu0 %675  ;;  %v2659_v61 = vpop.permute.xlu1 %1115 }
 0x1f5   : > { %v1089_v56 = vpop.permute.xlu0 %1088  ;;  %v2663_v24 = vpop.permute.xlu1 %1126 }
 0x1f6   : > { %v1092_v25 = vsel %vm429_vm1, %v1089_v56, %v1091_v57 }
 0x1f9   : > { %v1103_v58 = vpop.permute.xlu0 %1102  ;;  %v1058_v35 = vpop.permute.xlu1 %1057 }
 0x1fa   : > { %v1106_v2 = vsel %vm456_vm2, %v1103_v58, %v2657_v59 }
 0x1fd   : > { %v1114_v60 = vpop.permute.xlu0 %1113 }
 0x1fe   : > { %v1117_v5 = vsel %vm478_vm3, %v1114_v60, %v2659_v61 }
 0x201   : > { %v2661_v62 = vpop.permute.xlu0 %1124 }
 0x205   : > { %v2672_v9 = vpop.permute.xlu0 %1055 }
 0x206   : > { %v1059_v23 = vsel %vm366_vm5, %v2672_v9, %v1058_v35 }
 0x2b6   : > { %v918_v63 = vpop.f32.mrb[0].mxu0 }
 0x2b7   : > { %v2665_v0 = vpop.f32.mrb[1].mxu0  ;;  %v2667_v37 = vpop.f32.mrb[0].mxu1 }
 0x2b8   : > { %v996_v1 = vpop.f32.mrb[1].mxu1 }
 0x2ba   : > { %v923_v8 = vpop.f32.mrb[2].mxu0 }
 0x2bb   : > { %v924_v10 = vadd.f32 %v923_v8, %v676_v54  ;;  %v925_v12 = vpop.f32.mrb[3].mxu0  ;;  %v999_v13 = vpop.f32.mrb[2].mxu1 }
 0x2bc   : > { %v926_v48 = vadd.f32 %v925_v12, %v676_v54  ;;  %v1000_v15 = vadd.f32 %v999_v13, %v676_v54  ;;  %v1001_v21 = vpop.f32.mrb[3].mxu1 }
 0x2bd   : > { %v1006_v11 = vmax.f32 %v924_v10, 0.0  ;;  %v1002_v42 = vadd.f32 %v1001_v21, %v676_v54  ;;  %v1128_v54 = vsel %vm500_vm4, %v2661_v62, %v2663_v24 }
 0x2be   : > { %v1007_v39 = vmax.f32 %v926_v48, 0.0  ;;  %v1008_v19 = vmax.f32 %v1000_v15, 0.0 }
 0x2bf   : > { %v1033_v41 = vmul.f32 %v1016_v22, %v1006_v11  ;;  %v1009_v47 = vmax.f32 %v1002_v42, 0.0 }
 0x2c0   : > { %v1034_v3 = vmul.f32 %v1020_v14, %v1007_v39  ;;  %v1035_v29 = vmul.f32 %v1024_v20, %v1008_v19 }
 0x2c1   : > { %1138 = vrot.lane.b32.xlu1 %v1033_v41, %s2139_s22  ;;  %v1096_v40 = vmul.f32 %v1089_v56, %v1033_v41  ;;  %v1085_v50 = vmul.f32 %v2655_v27, %v1033_v41  ;;  %v1036_v51 = vmul.f32 %v1028_v49, %v1009_v47 }
 0x2c2   : > { %v1064_v32 = vmul.f32 %v1059_v23, %v1034_v3  ;;  %v1065_v33 = vmul.f32 %v1058_v35, %v1035_v29  ;;  %v1927_v45 = vpack.i.bf16 %v1035_v29, %v1034_v3  ;;  %v1097_v31 = vmul.f32 %v1092_v25, %v1034_v3 }
 0x2c3   : > { %v1098_v36 = vmul.f32 %v1091_v57, %v1035_v29  ;;  %v1086_v16 = vmul.f32 %v1081_v30, %v1034_v3  ;;  %v1087_v28 = vmul.f32 %v1080_v55, %v1035_v29  ;;  %v1110_v17 = vmul.f32 %v1103_v58, %v1034_v3 }
 0x2c4   : > { %v1962_v46 = vpack.i.bf16 %v1065_v33, %v1064_v32  ;;  %1928 = vrot.lane.b32.xlu0 %v1927_v45, %s2139_s22  ;;  %v1111_v34 = vmul.f32 %v1106_v2, %v1035_v29  ;;  %v1121_v18 = vmul.f32 %v1114_v60, %v1034_v3  ;;  %v1122_v26 = vmul.f32 %v1117_v5, %v1035_v29  ;;  %s2860_s22 = smov 126  }
 0x2c5   : > { %1938 = vrot.lane.b32.xlu1 %v1927_v45, %s2144_s12  ;;  %v1947_v38 = vpack.i.bf16 %v1098_v36, %v1097_v31  ;;  %v1942_v7 = vpack.i.bf16 %v1087_v28, %v1086_v16  ;;  %v1112_v52 = vmul.f32 %v2657_v59, %v1036_v51  ;;  %v1132_v53 = vmul.f32 %v2661_v62, %v1034_v3 }
 0x2c6   : > { %v1952_v43 = vpack.i.bf16 %v1111_v34, %v1110_v17  ;;  %v1957_v44 = vpack.i.bf16 %v1122_v26, %v1121_v18  ;;  %v1123_v4 = vmul.f32 %v2659_v61, %v1036_v51  ;;  %v1134_v27 = vmul.f32 %v2663_v24, %v1036_v51 }
 0x2c7   : > { %v1133_v55 = vmul.f32 %v1128_v54, %v1035_v29  ;;  %v1063_v61 = vmul.f32 %v2672_v9, %v1033_v41 }
 0x2c8   : > { %1933 = vrot.lane.b32.xlu0 %v1927_v45, %s2143_s9  ;;  %s2862_s9 = smov 96  }
 0x2c9   : > { %1160 = vrot.lane.b32.xlu1 %v1096_v40, %s2146_s20 }
 0x2cc   : > { %1149 = vrot.lane.b32.xlu0 %v1085_v50, %s2860_s22 }
 0x2cd   : > { %1948 = vrot.lane.b32.xlu1 %v1947_v38, %s2146_s20 }
 0x2d0   : > { %1943 = vrot.lane.b32.xlu0 %v1942_v7, %s2860_s22  ;;  %s1606_s22 = sshll.u32 %s2302_s11, 2 }
 0x2d1   : > { %1953 = vrot.lane.b32.xlu1 %v1952_v43, %s2861_s10 }
 0x2d4   : > { %1180 = vrot.lane.b32.xlu0 %v1112_v52, %s2861_s10  ;;  %s1624_s10 = sshll.u32 %s2127_s27, 6  ;;  %s2152_s27 = smov [#allocation6]  }
 0x2d5   : > { %1958 = vrot.lane.b32.xlu1 %v1957_v44, %s2862_s9  ;;  %s2786_s17 = scalar_lea.hbm %s2842_s7, %s1624_s10 }
 0x2d8   : > { %1191 = vrot.lane.b32.xlu0 %v1123_v4, %s2862_s9  ;;  %v666_v4 = vld [vmem:[%s2838_s3] sm:$0xff]  ;;  %s327_s9 = scalar_lea.vmem [#allocation6], %s1606_s22 }
 0x2d9   : > { %1209 = vrot.lane.b32.xlu1 %v1132_v53, %s2863_s13  ;;  %v1218_v53 = vld [vmem:[%s2840_s5] sm:$0xff] }
 0x2dc   : > { %1202 = vrot.lane.b32.xlu0 %v1036_v51, %s2144_s12 }
 0x2dd   : > { %1213 = vrot.lane.b32.xlu1 %v1134_v27, %s2863_s13 }
 0x2e0   : > { %1211 = vrot.lane.b32.xlu0 %v1133_v55, %s2863_s13  ;;  %s1500_s13 = sshll.u32 %s327_s9, 4  ;;  %s2788_s13 = int_to_ptr.vmem [resolvable:$true] %s1500_s13 }
 0x2e1   : > { %s2053_s18 = scalar_lea.vmem %s2788_s13, 64 }
 0x2e2   : > { %p2054_p8 = scmp.ne.s32.totalorder %s2788_s13, %s2053_s18 }
 0x2e4   : > { %1963 = vrot.lane.b32.xlu0 %v1962_v46, %s2142_s30  ;;  %p2055_p11 = pnand %p2054_p8, %p2864_p9 }
 0x2e6   : > { %p2056_p0 = pneg %p2055_p11 }
 0x333   : > { %v1139_v56 = vpop.permute.xlu1 %1138 }
 0x336   : > { %v1929_v57 = vpop.permute.xlu0 %1928 }
 0x337   : > { %v2712_v58 = vpop.permute.xlu1 %1938  ;;  %v1931_v59 = vunpack.i.h.bf16 %v1929_v57  ;;  %v1930_v60 = vunpack.i.l.bf16 %v1929_v57 }
 0x338   : > { %v1941_v33 = vunpack.i.h.bf16 %v2712_v58  ;;  %v1940_v45 = vunpack.i.l.bf16 %v2712_v58 }
 0x339   : > { %v1145_v63 = vsel %vm429_vm1, %v1930_v60, %v1931_v59  ;;  %v1144_v62 = vsel %vm429_vm1, %v1139_v56, %v1930_v60 }
 0x33a   : > { %v1967_v24 = vpack.i.bf16 %v1931_v59, %v1145_v63  ;;  %v1972_v1 = vpack.i.bf16 %v1144_v62, %v1063_v61  ;;  %v1934_v6 = vpop.permute.xlu0 %1933  ;;  %v1204_v26 = vsel %vm639_vm6, %v1940_v45, %v1941_v33 }
 0x33b   : > { %v1161_v8 = vpop.permute.xlu1 %1160  ;;  %v1936_v10 = vunpack.i.h.bf16 %v1934_v6  ;;  %v1935_v22 = vunpack.i.l.bf16 %v1934_v6 }
 0x33c   : > { %1968 = vrot.lane.b32.xlu1 %v1967_v24, %s2142_s30  ;;  %1973 = vrot.lane.b32.xlu0 %v1972_v1, %s2142_s30 }
 0x33d   : > { %v1172_v12 = vsel %vm366_vm5, %v1935_v22, %v1936_v10 }
 0x33e   : > { %v1977_v13 = vpack.i.bf16 %v1936_v10, %v1172_v12  ;;  %v1150_v48 = vpop.permute.xlu0 %1149 }
 0x33f   : > { %v1949_v14 = vpop.permute.xlu1 %1948 }
 0x340   : > { %v1951_v9 = vunpack.i.h.bf16 %v1949_v14  ;;  %v1950_v15 = vunpack.i.l.bf16 %v1949_v14  ;;  %1978 = vrot.lane.b32.xlu0 %v1977_v13, %s2142_s30 }
 0x342   : > { %v1167_v20 = vsel %vm568_vm8, %v1950_v15, %v1951_v9  ;;  %v1944_v35 = vpop.permute.xlu0 %1943  ;;  %v1166_v32 = vsel %vm568_vm8, %v1161_v8, %v1950_v15 }
 0x343   : > { %v1987_v21 = vpack.i.bf16 %v1951_v9, %v1167_v20  ;;  %v1954_v11 = vpop.permute.xlu1 %1953  ;;  %v1946_v39 = vunpack.i.h.bf16 %v1944_v35  ;;  %v1945_v19 = vunpack.i.l.bf16 %v1944_v35 }
 0x344   : > { %v1955_v41 = vunpack.i.l.bf16 %v1954_v11  ;;  %v1956_v2 = vunpack.i.h.bf16 %v1954_v11 }
 0x345   : > { %1988 = vrot.lane.b32.xlu0 %v1987_v21, %s2142_s30  ;;  %v1156_v23 = vsel %vm548_vm7, %v1945_v19, %v1946_v39  ;;  %v1155_v30 = vsel %vm548_vm7, %v1150_v48, %v1945_v19 }
 0x346   : > { %v1992_v25 = vpack.i.bf16 %v1955_v41, %v1935_v22  ;;  %v1982_v3 = vpack.i.bf16 %v1946_v39, %v1156_v23  ;;  %v1181_v29 = vpop.permute.xlu0 %1180  ;;  %v2002_v31 = vpack.i.bf16 %v1166_v32, %v1155_v30  ;;  %v1182_v36 = vsel %vm599_vm9, %v1955_v41, %v1956_v2 }
 0x347   : > { %v1959_v5 = vpop.permute.xlu1 %1958  ;;  %v1183_v16 = vsel %vm599_vm9, %v1956_v2, %v1181_v29 }
 0x348   : > { %1983 = vrot.lane.b32.xlu1 %v1982_v3, %s2142_s30  ;;  %v1961_v28 = vunpack.i.h.bf16 %v1959_v5  ;;  %v1960_v17 = vunpack.i.l.bf16 %v1959_v5  ;;  %v2007_v34 = vpack.i.bf16 %v1183_v16, %v1182_v36 }
 0x349   : > { %1993 = vrot.lane.b32.xlu0 %v1992_v25, %s2142_s30 }
 0x34a   : > { %v1192_v46 = vpop.permute.xlu0 %1191  ;;  %v1193_v7 = vsel %vm619_vm10, %v1960_v17, %v1961_v28  ;;  %v2017_v50 = vpack.i.bf16 %v1940_v45, %v1960_v17 }
 0x34b   : > { %v1194_v18 = vsel %vm619_vm10, %v1961_v28, %v1192_v46  ;;  %v1210_v47 = vpop.permute.xlu1 %1209 }
 0x34c   : > { %2003 = vrot.lane.b32.xlu1 %v2002_v31, %s2142_s30  ;;  %v2012_v43 = vpack.i.bf16 %v1194_v18, %v1193_v7 }
 0x34e   : > { %v1203_v38 = vpop.permute.xlu0 %1202 }
 0x34f   : > { %v1205_v42 = vsel %vm639_vm6, %v1941_v33, %v1203_v38  ;;  %v1214_v51 = vpop.permute.xlu1 %1213 }
 0x350   : > { %v1997_v40 = vpack.i.bf16 %v1205_v42, %v1204_v26  ;;  %2008 = vrot.lane.b32.xlu1 %v2007_v34, %s2142_s30 }
 0x352   : > { %v1212_v44 = vpop.permute.xlu0 %1211  ;;  %1998 = vrot.lane.b32.xlu0 %v1997_v40, %s2142_s30 }
 0x353   : > { %v1215_v49 = vsel %vm659_vm11, %v1210_v47, %v1212_v44  ;;  %v1216_v52 = vsel %vm659_vm11, %v1212_v44, %v1214_v51 }
 0x354   : > { %2013 = vrot.lane.b32.xlu1 %v2012_v43, %s2142_s30 }
 0x356   : > { %1277 = vrot.lane.b32.xlu0 %v1215_v49, %s2142_s30  ;;  %v1964_v27 = vpop.permute.xlu0 %1963 }
 0x357   : > { %v1966_v54 = vunpack.i.h.bf16 %v1964_v27  ;;  %v1965_v55 = vunpack.i.l.bf16 %v1964_v27 }
 0x358   : > { %2018 = vrot.lane.b32.xlu1 %v2017_v50, %s2142_s30 }
 0x359   : > { %v1282_v24 = vsel %vm500_vm4, %v1965_v55, %v1966_v54 }
 0x35a   : > { %1275 = vrot.lane.b32.xlu0 %v1210_v47, %s2142_s30 }
 0x35c   : > { %1279 = vrot.lane.b32.xlu1 %v1216_v52, %s2142_s30  ;;  %s2057_s30 = sshll.u32 %s2152_s27, 4  ;;  %s2058_s30 = int_to_ptr.vmem [resolvable:$false] %s2057_s30 }
 0x35d   : > { %s2059_s19 = scalar_lea.vmem %s2058_s30, 128  ;;  %p2060_p5 = scmp.lt.s32.totalorder %s2788_s13, %s2058_s30 }
 0x35e   : > { %1221 = vperm.xlu0 %1926, %v1218_v53   ;;  %p2061_p13 = scmp.lt.s32.totalorder %s2059_s19, %s2053_s18 }
 0x360   : > { %670 = vperm.xlu1 %2022, %v666_v4   ;;  %p2062_p2 = por %p2061_p13, %p2060_p5 }
 0x362   : > { %p2063_p4 = pnand %p2062_p2, %p2056_p0 }
 0x3ae   : > { %v1969_v56 = vpop.permute.xlu1 %1968  ;;  %v1974_v57 = vpop.permute.xlu0 %1973 }
 0x3af   : > { %v1971_v58 = vunpack.i.h.bf16 %v1969_v56  ;;  %v1970_v59 = vunpack.i.l.bf16 %v1969_v56  ;;  %v1976_v60 = vunpack.i.h.bf16 %v1974_v57  ;;  %v1975_v61 = vunpack.i.l.bf16 %v1974_v57 }
 0x3b1   : > { %v1283_v63 = vsel %vm500_vm4, %v1976_v60, %v1970_v59  ;;  %v1281_v62 = vsel %vm500_vm4, %v1975_v61, %v1965_v55  ;;  %v1284_v1 = vsel %vm500_vm4, %v1970_v59, %v1971_v58  ;;  %v1217_v55 = vld [vmem:[%s2839_s4] sm:$0xff] }
 0x3b2   : > { %v1659_v6 = vpack.c.bf16 %v1283_v63, %v1281_v62  ;;  %v1979_v8 = vpop.permute.xlu0 %1978  ;;  %v1657_v10 = vpack.c.bf16 %v1284_v1, %v1282_v24 }
 0x3b3   : > { %v1981_v41 = vunpack.i.h.bf16 %v1979_v8  ;;  %v1980_v23 = vunpack.i.l.bf16 %v1979_v8 }
 0x3b4   : > { %1658 = vmatprep.subr.bf16.mxu0 %v1657_v10 }
 0x3b5   : > { %1660 = vmatpush1.bf16.msra.mxu0 %v1659_v6  ;;  %v1290_v46 = vsel %vm500_vm4, %v1980_v23, %v1981_v41 }
 0x3b7   : > { %v1989_v22 = vpop.permute.xlu0 %1988 }
 0x3b8   : > { %v1991_v12 = vunpack.i.h.bf16 %v1989_v22  ;;  %v1990_v13 = vunpack.i.l.bf16 %v1989_v22 }
 0x3ba   : > { %v1984_v48 = vpop.permute.xlu1 %1983  ;;  %v1288_v21 = vsel %vm500_vm4, %v1990_v13, %v1991_v12 }
 0x3bb   : > { %v1986_v14 = vunpack.i.h.bf16 %v1984_v48  ;;  %v1985_v9 = vunpack.i.l.bf16 %v1984_v48  ;;  %v1994_v15 = vpop.permute.xlu0 %1993 }
 0x3bc   : > { %v1995_v25 = vunpack.i.l.bf16 %v1994_v15  ;;  %v1996_v5 = vunpack.i.h.bf16 %v1994_v15 }
 0x3bd   : > { %v1286_v20 = vsel %vm500_vm4, %v1985_v9, %v1986_v14 }
 0x3be   : > { %v2004_v35 = vpop.permute.xlu1 %2003  ;;  %v1661_v11 = vpack.c.bf16 %v1288_v21, %v1286_v20  ;;  %v1289_v45 = vsel %vm500_vm4, %v1995_v25, %v1980_v23 }
 0x3bf   : > { %v2006_v39 = vunpack.i.h.bf16 %v2004_v35  ;;  %v2005_v19 = vunpack.i.l.bf16 %v2004_v35 }
 0x3c0   : > { %1662 = vmatprep.subr.bf16.mxu0 %v1661_v11 }
 0x3c1   : > { %v1285_v3 = vsel %vm500_vm4, %v2005_v19, %v1985_v9  ;;  %v1287_v29 = vsel %vm500_vm4, %v2006_v39, %v1990_v13  ;;  %v1395_v13 = vld [vmem:[%s2306_s21 + $0x18] sm:$0x3] }
 0x3c2   : > { %v1663_v30 = vpack.c.bf16 %v1287_v29, %v1285_v3  ;;  %v2009_v2 = vpop.permute.xlu1 %2008 }
 0x3c3   : > { %v2011_v32 = vunpack.i.h.bf16 %v2009_v2  ;;  %v2010_v33 = vunpack.i.l.bf16 %v2009_v2 }
 0x3c4   : > { %v1999_v31 = vpop.permute.xlu0 %1998  ;;  %1664 = vmatpush1.bf16.msra.mxu0 %v1663_v30 }
 0x3c5   : > { %v1291_v36 = vsel %vm500_vm4, %v1996_v5, %v2010_v33  ;;  %v2001_v16 = vunpack.i.h.bf16 %v1999_v31  ;;  %v2000_v28 = vunpack.i.l.bf16 %v1999_v31  ;;  %v1292_v17 = vsel %vm500_vm4, %v2010_v33, %v2011_v32 }
 0x3c6   : > { %v1667_v34 = vpack.c.bf16 %v1291_v36, %v1289_v45  ;;  %v2014_v38 = vpop.permute.xlu1 %2013  ;;  %v1665_v7 = vpack.c.bf16 %v1292_v17, %v1290_v46 }
 0x3c7   : > { %v2016_v18 = vunpack.i.h.bf16 %v2014_v38  ;;  %v2015_v26 = vunpack.i.l.bf16 %v2014_v38  ;;  %v1296_v40 = vsel %vm500_vm4, %v2000_v28, %v2001_v16 }
 0x3c8   : > { %1666 = vmatprep.subr.bf16.mxu0 %v1665_v7  ;;  %v1278_v43 = vpop.permute.xlu0 %1277 }
 0x3c9   : > { %1668 = vmatpush1.bf16.msra.mxu0 %v1667_v34  ;;  %v1294_v42 = vsel %vm500_vm4, %v2015_v26, %v2016_v18 }
 0x3ca   : > { %v2019_v44 = vpop.permute.xlu1 %2018  ;;  %v1669_v47 = vpack.c.bf16 %v1296_v40, %v1294_v42 }
 0x3cb   : > { %v2021_v49 = vunpack.i.h.bf16 %v2019_v44  ;;  %v2020_v50 = vunpack.i.l.bf16 %v2019_v44 }
 0x3cc   : > { %1670 = vmatprep.subr.bf16.mxu0 %v1669_v47  ;;  %v1276_v54 = vpop.permute.xlu0 %1275 }
 0x3cd   : > { %v1293_v51 = vsel %vm500_vm4, %v2020_v50, %v2015_v26  ;;  %v1295_v52 = vsel %vm500_vm4, %v2021_v49, %v2000_v28  ;;  %v1297_v56 = vsel %vm500_vm4, %v1276_v54, %v1278_v43 }
 0x3ce   : > { %v1671_v53 = vpack.c.bf16 %v1295_v52, %v1293_v51  ;;  %v1280_v4 = vpop.permute.xlu1 %1279 }
 0x3cf   : > { %v1298_v27 = vsel %vm500_vm4, %v1278_v43, %v1280_v4 }
 0x3d0   : > { %1672 = vmatpush1.bf16.msra.mxu0 %v1671_v53 }
 0x3d1   : > { %1336 = vmatprep.subr.mxu0 %v1298_v27 }
 0x3d4   : > { %1337 = vmatpush1.msra.mxu0 %v1297_v56 }
 0x3d5   : > { %1616 = vmatmul.mubr.msk.f32.vlgmr.msra.gmra.mrb[4].mxu0 %vm845_vm12, %v1217_v55 }
 0x3dd   : > { %v1222_v59 = vpop.permute.xlu0 %1221 }
 0x3df   : > { %v671_v57 = vpop.permute.xlu1 %670 }
 0x3e0   : > { %v920_v58 = vadd.f32 %v2665_v0, %v671_v57  ;;  %v995_v60 = vadd.f32 %v2667_v37, %v671_v57  ;;  %v1393_v0 = vld [vmem:[%s2841_s6] sm:$0x3] }
 0x3e1   : > { %v1394_v37 = vld [vmem:[%s2306_s21 + $0x10] sm:$0x3]  ;;  %s1484_s21 = scalar_lea.sflag [#allocation5], %s2302_s11 }
 0x3e2   : > { %v1004_v1 = vmax.f32 %v920_v58, 0.0  ;;  %v1005_v8 = vmax.f32 %v995_v60, 0.0 }
 0x4a8   : > { %v1386_v61 = vpop.f32.mrb[4].mxu0 }
 0x4a9   : > { %v1387_v63 = vadd.f32 %v1386_v61, %v1222_v59  ;;  %v1388_v62 = vpop.f32.mrb[5].mxu0 }
 0x4aa   : > { %v1389_v24 = vadd.f32 %v1388_v62, %v1222_v59 }
 0x4ab   : > { %v1391_v6 = vmax.f32 %v1387_v63, 0.0 }
 0x4ac   : > { %v1392_v10 = vmax.f32 %v1389_v24, 0.0 }
 0x4ad   : > { %v1675_v22 = vpack.c.bf16 %v1391_v6, %v1004_v1 }
 0x4ae   : > { %v1673_v12 = vpack.c.bf16 %v1392_v10, %v1005_v8 }
 0x4b0   : > { %1674 = vmatprep.subr.bf16.mxu1 %v1673_v12 }
 0x4b1   : > { %1676 = vmatpush1.bf16.msra.mxu1 %v1675_v22 }
 0x4b4   : > { %1617 = vmatmul.mubr.msk.f32.vlgmr.msra.gmra.mrb[4].mxu1 %vm1396_vm13, %v1393_v0 }
 0x587   : > { %v1466_v48 = vpop.f32.mrb[4].mxu1 }
 0x588   : > { %v1467_v14 = vadd.f32 %v1466_v48, %v1394_v37  ;;  %v1468_v9 = vpop.f32.mrb[5].mxu1 }
 0x589   : > { %v1469_v15 = vadd.f32 %v1468_v9, %v1395_v13 }
 0x58b   : > { %v1473_v20 = vcombine.low %v1467_v14, %v1469_v15 }
 0x58d   : > { %1618 = vst.sshfl [vmem:[%s327_s9] sm:$0x33 pattern:$0x76325410] %v1473_v20 }
 0x58e   : > { %2066 = shalt.err (!%p2063_p4)
}
 0x58f   : > { %s2067_s11 = scalar_lea.hbm %s2786_s17, 64  ;;  %s2071_s22 = scalar_lea.hbm %s2842_s7, 128 }
 0x590   : > { %p2068_p6 = scmp.ne.s32.totalorder %s2786_s17, %s2067_s11  ;;  %p2072_p12 = scmp.lt.u32.totalorder %s2786_s17, %s2842_s7 }
 0x591   : > { %p2073_p1 = scmp.lt.u32.totalorder %s2071_s22, %s2067_s11  ;;  %p2075_p8 = scmp.lt.u32.totalorder %s2067_s11, %s2786_s17 }
 0x592   : > { %p2069_p7 = pnand %p2068_p6, %p2864_p9 }
 0x593   : > { %p2074_p3 = por %p2073_p1, %p2072_p12 }
 0x594   : > { %p2070_p10 = pneg %p2069_p7 }
 0x595   : > { %p2076_p11 = por %p2075_p8, %p2074_p3 }
 0x597   : > { %p2077_p0 = pnand %p2076_p11, %p2070_p10 }
 0x599   : > { %2080 = shalt.err (!%p2077_p0)
}
 0x59a   : > { %1682 = dma.vmem_to_hbm [thread:$0]  (%p2864_p9), %s2788_s13, 64, %s2786_s17, %s1484_s21  }
 0x59b PF: > { %s1512_s12 = sand.u32 1, %s2115_s24   ;;  %p2865_p5 = scmp.ne.s32.totalorder %s2857_s16, 0 }
 0x59c   : > { %p2866_p13 = scmp.ge.s32.totalorder %s2135_s29, 2  ;;  %s1513_s20 = scalar_lea.sflag [#allocation5], %s1512_s12 }
 0x59e   : > { %p1689_p2 = pnand %p2866_p13, %p2865_p5 }
 0x5a0   : > { %2110 = dma.done.wait (!%p1689_p2), %s1513_s20, 64  }
 0x5a1   : > { %2112 = vsyncadd (!%p1689_p2), %s1513_s20, 4294967232  ;;  %s23_s29 = sadd.s32 1, %s2135_s29   ;;  %s2867_s14 = sld [smem:[#allocation9_spill]] }
 0x5a2   : > { %p20_p4 = scmp.ge.s32.totalorder %s23_s29, 4   ;;  %s2868_s24 = smov %s2119_s25 }
 0x5a3   : > { %s2869_s25 = smov %s2123_s26  ;;  %s2870_s26 = smov %s2249_s15 }
 0x5a4   : > { %s2871_s27 = smov %s2131_s28  ;;  %22 = sbr.rel (!%p20_p4) target bundleno = 6 (0x6), region = 101 }
 0x5a7   : > { %s2872_s28 = smov %s2867_s14 }
 0x5ab   :  { %1518 = vsyncpa [#allocation4], 1 }
 0x5ac   :  { %1520 = vsyncpa [#allocation4 + $0x1], 1 }
 0x5ad   :  { %1521 = vsyncpa [#allocation5], 1 }
 0x5ae   :  { %1523 = vsyncpa [#allocation5 + $0x1], 1 }

</bundles_post_ra>
